<compile_context>
chip_gen: v5e
topology: v5e:2x2
jax: 0.10.0
libtpu: 0.0.40
codegen_flags: <defaults>
</compile_context>

<pallas_src>
import functools

import jax
import jax.numpy as jnp
from jax.experimental import pallas as pl
from jax.experimental.pallas import tpu as pltpu


# ----------------------------------------------------------------------------
# Fused encoder-layer kernel: one grid step = one block of `bb` batch elements
# ----------------------------------------------------------------------------

def _encoder_layer_kernel(x_ref, wqkv_ref, wtfc_ref, wvar_ref, fcb_ref,
                          w1_ref, w2_ref, bias_ref,
                          out_ref, at_ref, av_ref,
                          *, bb, n_steps, n_heads, d_k, d_v, d_inner,
                          bias_off, eps):
    S, H = n_steps, n_heads
    HDK = H * d_k
    x = x_ref[...]                                   # (bb*S, D) f32
    D = x.shape[-1]

    # Consolidated per-feature params: one lane-dense (1, 256) row, statically
    # sliced (replaces 6 separate tiny DMA-ed inputs).
    o = bias_off
    ln1_g = bias_ref[:, o[0]:o[0] + D]
    ln1_b = bias_ref[:, o[1]:o[1] + D]
    b1 = bias_ref[:, o[2]:o[2] + d_inner]
    b2 = bias_ref[:, o[3]:o[3] + D]
    ln2_g = bias_ref[:, o[4]:o[4] + D]
    ln2_b = bias_ref[:, o[5]:o[5] + D]

    # Fused Q/K/V projection for the whole batch block: one MXU pass over x.
    # K columns were pre-scaled by 1/temperature at pack time.
    qkv = jnp.dot(x, wqkv_ref[...], preferred_element_type=jnp.float32)

    at_blocks, av_blocks, vtime_blocks, vvar_blocks = [], [], [], []
    for b in range(bb):                              # static unroll: batch block
        r0 = b * S
        at_heads, av_heads, ov_heads = [], [], []
        vt_b = jnp.zeros((S, D), jnp.float32)
        for h in range(H):                           # static unroll: heads
            q_h = qkv[r0:r0 + S, h * d_k:(h + 1) * d_k]                      # (S, d_k)
            k_h = qkv[r0:r0 + S, HDK + h * d_k:HDK + (h + 1) * d_k]          # (S, d_k)
            v_h = qkv[r0:r0 + S, 2 * HDK + h * d_v:2 * HDK + (h + 1) * d_v]  # (S, d_v)

            # attn_time = softmax((q/temp) k^T, axis=-1)              -> (S, S)
            st = jax.lax.dot_general(q_h, k_h, (((1,), (1,)), ((), ())),
                                     preferred_element_type=jnp.float32)
            st = st - jnp.max(st, axis=-1, keepdims=True)
            et = jnp.exp(st)
            at_h = et / jnp.sum(et, axis=-1, keepdims=True)           # exact softmax

            # attn_variable = softmax((k^T/temp) v, axis=-1)          -> (d_k, d_v)
            sv = jax.lax.dot_general(k_h, v_h, (((0,), (0,)), ((), ())),
                                     preferred_element_type=jnp.float32)
            sv = sv - jnp.max(sv, axis=-1, keepdims=True)
            ev = jnp.exp(sv)
            av_h = ev / jnp.sum(ev, axis=-1, keepdims=True)

            at_heads.append(at_h)
            av_heads.append(av_h)

            ot_h = jnp.dot(at_h, v_h, preferred_element_type=jnp.float32)    # (S, d_v)
            ov_heads.append(jnp.dot(q_h, av_h, preferred_element_type=jnp.float32))

            # fc_time and the v_time half of fc are pre-folded into wtfc.
            vt_b = vt_b + jnp.dot(ot_h, wtfc_ref[h * d_v:(h + 1) * d_v, :],
                                  preferred_element_type=jnp.float32)

        # fc_varible: one (S, H*S) @ (H*S, d_v) matmul per batch element; the
        # two surrounding torch transposes are folded into the weight layout.
        ov_b = jnp.concatenate(ov_heads, axis=0)                       # (H*S, d_v)
        vvar_b = jnp.dot(wvar_ref[...], ov_b, preferred_element_type=jnp.float32)

        at_blocks.append(jnp.stack(at_heads, axis=0))                  # (H, S, S)
        av_blocks.append(jnp.stack(av_heads, axis=0))                  # (H, d_k, d_v)
        vtime_blocks.append(vt_b)
        vvar_blocks.append(vvar_b)

    # Single wide store per output per grid step.
    at_ref[...] = jnp.stack(at_blocks, axis=0)                         # (bb, H, S, S)
    av_ref[...] = jnp.stack(av_blocks, axis=0)                         # (bb, H, d_k, d_v)

    v_time = jnp.concatenate(vtime_blocks, axis=0)                     # (bb*S, D)
    v_var = jnp.concatenate(vvar_blocks, axis=0)                       # (bb*S, d_v)

    # MHA output proj: v_time already carries fc_time∘fc_a; add the fc_b half.
    v_out = v_time + jnp.dot(v_var, fcb_ref[...], preferred_element_type=jnp.float32)

    # dropout (eval) = identity; residual + LayerNorm (eps = 1e-6)
    z = v_out + x
    mu = jnp.mean(z, axis=-1, keepdims=True)
    var = jnp.mean((z - mu) ** 2, axis=-1, keepdims=True)
    zn = (z - mu) * jax.lax.rsqrt(var + eps) * ln1_g + ln1_b

    # position-wise FFN + residual + LayerNorm, fully fused
    h1 = jnp.maximum(
        jnp.dot(zn, w1_ref[...], preferred_element_type=jnp.float32) + b1, 0.0)
    y = jnp.dot(h1, w2_ref[...], preferred_element_type=jnp.float32) + b2
    z2 = y + zn
    mu2 = jnp.mean(z2, axis=-1, keepdims=True)
    var2 = jnp.mean((z2 - mu2) ** 2, axis=-1, keepdims=True)
    out_ref[...] = (z2 - mu2) * jax.lax.rsqrt(var2 + eps) * ln2_g + ln2_b


# ----------------------------------------------------------------------------
# Forward wrapper: grid = one step per TensorCore
# ----------------------------------------------------------------------------

def _num_tensorcores():
    """Grid rule from the review: number of grid steps = number of TensorCores."""
    try:
        kind = jax.devices()[0].device_kind.lower()
    except Exception:  # pragma: no cover
        return 1
    return 2 if "7" in kind else 1       # v7x: 2 TCs/chip; v5e/v6e: 1


def encoder_layer_forward(packed, enc_input, epoch=0, grid_steps=None):
    # TODO(synk): epoch-in-(starttime,170] randperm-based attention masking not
    # ported (data-dependent, non-deterministic host logic); inert for epoch<=10.
    del epoch
    B, S, D = enc_input.shape
    H, d_k, d_v = packed["n_heads"], packed["d_k"], packed["d_v"]
    d_inner = packed["d_inner"]
    assert d_v == D, "module's reshapes require d_v == d_model"

    if grid_steps is None:
        grid_steps = max(1, min(B, _num_tensorcores()))
        while B % grid_steps:
            grid_steps -= 1
    assert B % grid_steps == 0
    bb = B // grid_steps

    # Fold batch into the matmul M dimension (B*S rows per step on 1-TC chips).
    x2 = enc_input.reshape(B * S, D).astype(jnp.float32)

    weights = [packed["w_qkv"], packed["w_time_fc"], packed["w_var2"],
               packed["fc_b_t"], packed["ffn_w1_t"], packed["ffn_w2_t"],
               packed["bias_pack"]]

    def _full(a):
        zeros = (0,) * a.ndim
        return pl.BlockSpec(a.shape, lambda i, _z=zeros: _z)

    kern = functools.partial(
        _encoder_layer_kernel, bb=bb, n_steps=S, n_heads=H, d_k=d_k, d_v=d_v,
        d_inner=d_inner, bias_off=packed["bias_off"], eps=1e-6)

    out2, attn_time, attn_variable = pl.pallas_call(
        kern,
        out_shape=(jax.ShapeDtypeStruct((B * S, D), jnp.float32),
                   jax.ShapeDtypeStruct((B, H, S, S), jnp.float32),
                   jax.ShapeDtypeStruct((B, H, d_k, d_v), jnp.float32)),
        grid=(grid_steps,),
        in_specs=[pl.BlockSpec((bb * S, D), lambda i: (i, 0))]
                 + [_full(w) for w in weights],
        out_specs=(pl.BlockSpec((bb * S, D), lambda i: (i, 0)),
                   pl.BlockSpec((bb, H, S, S), lambda i: (i, 0, 0, 0)),
                   pl.BlockSpec((bb, H, d_k, d_v), lambda i: (i, 0, 0, 0))),
        compiler_params=pltpu.CompilerParams(
            dimension_semantics=("parallel",)),     # one step per TensorCore
    )(x2, *weights)

    return out2.reshape(B, S, D), attn_time, attn_variable


# ----------------------------------------------------------------------------
# Parameter init (PyTorch layout) and one-time pre-packing for the kernel
# ----------------------------------------------------------------------------

def init_params(key, n_steps, d_model, d_inner, n_heads, d_k, d_v):
    def uni(k, shape, fan_in):
        bound = 1.0 / (fan_in ** 0.5)
        return jax.random.uniform(k, shape, jnp.float32, -bound, bound)

    keys = jax.random.split(key, 10)
    return {
        "w_qs": uni(keys[0], (n_heads * d_k, d_model), d_model),
        "w_ks": uni(keys[1], (n_heads * d_k, d_model), d_model),
        "w_vs": uni(keys[2], (n_heads * d_v, d_model), d_model),
        "fc_time": uni(keys[3], (d_model, n_heads * d_v), n_heads * d_v),
        "fc_varible": uni(keys[4], (n_steps, n_heads * n_steps), n_heads * n_steps),
        "fc": uni(keys[5], (d_model, 2 * d_v), 2 * d_v),
        "ln1_g": jnp.ones((d_model,), jnp.float32),
        "ln1_b": jnp.zeros((d_model,), jnp.float32),
        "ffn_w1": uni(keys[6], (d_inner, d_model), d_model),
        "ffn_b1": uni(keys[7], (d_inner,), d_model),
        "ffn_w2": uni(keys[8], (d_model, d_inner), d_inner),
        "ffn_b2": uni(keys[9], (d_model,), d_inner),
        "ln2_g": jnp.ones((d_model,), jnp.float32),
        "ln2_b": jnp.zeros((d_model,), jnp.float32),
    }


def pack_params(p, n_steps, d_model, d_inner, n_heads, d_k, d_v):
    """One-time repack of torch-layout weights into the kernel layout."""
    S, H = n_steps, n_heads
    f32 = jnp.float32
    hp = jax.lax.Precision.HIGHEST
    temperature = float(d_k) ** 0.5

    # Stacked, pre-transposed QKV weight (d_model, 2*H*d_k + H*d_v); the
    # 1/temperature scale is folded into the K columns (both scores use K/temp).
    w_qkv = jnp.concatenate(
        [p["w_qs"], p["w_ks"] / temperature, p["w_vs"]], axis=0).T

    # fc_time composed with the v_time half of fc:  W_time^T @ fc[:, :d_v]^T.
    w_time_fc = jnp.dot(p["fc_time"].T, p["fc"][:, :d_v].T, precision=hp)

    # fc_varible (S, H*S) with torch input index m = s*H + h, re-laid out so the
    # kernel contracts a head-major (H*S, d_v) stack: new col index = h*S + s.
    w_var2 = (p["fc_varible"].reshape(S, S, H)
              .transpose(0, 2, 1).reshape(S, H * S))

    fc_b_t = p["fc"][:, d_v:].T                                   # (d_v, d_model)

    # All six per-feature vectors in one lane-dense row (padded to 128-mult).
    vecs = [p["ln1_g"], p["ln1_b"], p["ffn_b1"], p["ffn_b2"], p["ln2_g"], p["ln2_b"]]
    offs, acc = [], 0
    for v in vecs:
        offs.append(acc)
        acc += v.shape[0]
    padded = ((acc + 127) // 128) * 128
    flat = jnp.concatenate([v.astype(f32) for v in vecs])
    bias_pack = jnp.pad(flat, (0, padded - acc)).reshape(1, padded)

    return {
        "n_heads": H, "d_k": d_k, "d_v": d_v, "d_inner": d_inner,
        "w_qkv": w_qkv.astype(f32),
        "w_time_fc": w_time_fc.astype(f32),
        "w_var2": w_var2.astype(f32),
        "fc_b_t": fc_b_t.astype(f32),
        "ffn_w1_t": p["ffn_w1"].T.astype(f32),                    # (d_model, d_inner)
        "ffn_w2_t": p["ffn_w2"].T.astype(f32),                    # (d_inner, d_model)
        "bias_pack": bias_pack,
        "bias_off": tuple(offs),
    }


# ----------------------------------------------------------------------------
# Pure-JAX reference (mirrors the PyTorch module, eval mode, epoch inert)
# ----------------------------------------------------------------------------

def _reference_forward(p, x, n_heads, d_k, d_v):
    hp = jax.lax.Precision.HIGHEST
    B, S, D = x.shape
    H = n_heads
    temp = float(d_k) ** 0.5
    q = jnp.einsum("bsd,fd->bsf", x, p["w_qs"], precision=hp).reshape(B, S, H, d_k).transpose(0, 2, 1, 3)
    k = jnp.einsum("bsd,fd->bsf", x, p["w_ks"], precision=hp).reshape(B, S, H, d_k).transpose(0, 2, 1, 3)
    v = jnp.einsum("bsd,fd->bsf", x, p["w_vs"], precision=hp).reshape(B, S, H, d_v).transpose(0, 2, 1, 3)
    attn_time = jax.nn.softmax(jnp.einsum("bhsd,bhtd->bhst", q / temp, k, precision=hp), axis=-1)
    attn_var = jax.nn.softmax(jnp.einsum("bhsd,bhsv->bhdv", k / temp, v, precision=hp), axis=-1)
    out_time = jnp.einsum("bhst,bhtv->bhsv", attn_time, v, precision=hp)
    out_var = jnp.einsum("bhsd,bhdv->bhsv", q, attn_var, precision=hp)
    v_time = out_time.transpose(0, 2, 1, 3).reshape(B, S, H * d_v)
    v_time = jnp.einsum("bsf,df->bsd", v_time, p["fc_time"], precision=hp)
    v_var = out_var.transpose(0, 2, 1, 3).reshape(B, S * H, D).transpose(0, 2, 1)
    v_var = jnp.einsum("bcm,tm->bct", v_var, p["fc_varible"], precision=hp).transpose(0, 2, 1)
    vv = jnp.einsum("bsf,df->bsd", jnp.concatenate([v_time, v_var], axis=-1), p["fc"], precision=hp)
    z = vv + x

    def ln(a, g, b):
        mu = a.mean(-1, keepdims=True)
        var = ((a - mu) ** 2).mean(-1, keepdims=True)
        return (a - mu) / jnp.sqrt(var + 1e-6) * g + b

    zn = ln(z, p["ln1_g"], p["ln1_b"])
    h1 = jax.nn.relu(jnp.einsum("bsd,fd->bsf", zn, p["ffn_w1"], precision=hp) + p["ffn_b1"])
    y = jnp.einsum("bsf,df->bsd", h1, p["ffn_w2"], precision=hp) + p["ffn_b2"]
    return ln(y + zn, p["ln2_g"], p["ln2_b"]), attn_time, attn_var


if __name__ == "__main__":
    # Small config consistent with the module: d_v must equal d_model.
    B, S = 2, 8
    d_model, d_inner = 32, 64
    n_heads, d_k, d_v = 2, 16, 32

    key = jax.random.PRNGKey(0)
    pkey, xkey = jax.random.split(key)
    torch_params = init_params(pkey, S, d_model, d_inner, n_heads, d_k, d_v)
    packed = pack_params(torch_params, S, d_model, d_inner, n_heads, d_k, d_v)
    enc_input = jax.random.normal(xkey, (B, S, d_model), jnp.float32)

    epoch = 0  # <= starttime(10): the random masking branch is inert.
    enc_output, attn_time, attn_variable = encoder_layer_forward(
        packed, enc_input, epoch)
    jax.block_until_ready((enc_output, attn_time, attn_variable))

    assert enc_output.shape == (B, S, d_model)
    assert attn_time.shape == (B, n_heads, S, S)
    assert attn_variable.shape == (B, n_heads, d_k, d_v)
    assert bool(jnp.all(jnp.isfinite(enc_output)))

    # Loose-tolerance structural check against a pure-JAX reference (tolerance
    # covers MXU f32-via-bf16 pass differences; structural bugs are O(1)).
    ref_out, ref_at, ref_av = _reference_forward(
        torch_params, enc_input, n_heads, d_k, d_v)
    err_out = float(jnp.max(jnp.abs(enc_output - ref_out)))
    err_at = float(jnp.max(jnp.abs(attn_time - ref_at)))
    err_av = float(jnp.max(jnp.abs(attn_variable - ref_av)))
    assert err_at < 3e-2 and err_av < 3e-2 and err_out < 1e-1, (err_out, err_at, err_av)

    print("KERNEL_OK")
</pallas_src>

<mosaic_0001>
module attributes {stable_mosaic.version = 11 : i64} {
  func.func @_encoder_layer_kernel(%arg0: i32, %arg1: memref<16x32xf32, #tpu.memory_space<vmem>>, %arg2: memref<32x128xf32, #tpu.memory_space<vmem>>, %arg3: memref<64x32xf32, #tpu.memory_space<vmem>>, %arg4: memref<8x16xf32, #tpu.memory_space<vmem>>, %arg5: memref<32x32xf32, #tpu.memory_space<vmem>>, %arg6: memref<32x64xf32, #tpu.memory_space<vmem>>, %arg7: memref<64x32xf32, #tpu.memory_space<vmem>>, %arg8: memref<1x256xf32, #tpu.memory_space<vmem>>, %arg9: memref<16x32xf32, #tpu.memory_space<vmem>>, %arg10: memref<2x2x8x8xf32, #tpu.memory_space<vmem>>, %arg11: memref<2x2x16x32xf32, #tpu.memory_space<vmem>>) attributes {dimension_semantics = [#tpu.dimension_semantics<parallel>], iteration_bounds = array<i64: 1>, scalar_prefetch = 0 : i64, scratch_operands = 0 : i64, tpu.core_type = #tpu.core_type<tc>, window_params = [{transform_indices = @transform_0, window_bounds = array<i64: 16, 32>}, {pipeline_mode = #tpu.pipeline_mode<synchronous>, transform_indices = @transform_1, window_bounds = array<i64: 32, 128>}, {pipeline_mode = #tpu.pipeline_mode<synchronous>, transform_indices = @transform_2, window_bounds = array<i64: 64, 32>}, {pipeline_mode = #tpu.pipeline_mode<synchronous>, transform_indices = @transform_3, window_bounds = array<i64: 8, 16>}, {pipeline_mode = #tpu.pipeline_mode<synchronous>, transform_indices = @transform_4, window_bounds = array<i64: 32, 32>}, {pipeline_mode = #tpu.pipeline_mode<synchronous>, transform_indices = @transform_5, window_bounds = array<i64: 32, 64>}, {pipeline_mode = #tpu.pipeline_mode<synchronous>, transform_indices = @transform_6, window_bounds = array<i64: 64, 32>}, {pipeline_mode = #tpu.pipeline_mode<synchronous>, transform_indices = @transform_7, window_bounds = array<i64: 1, 256>}, {transform_indices = @transform_8, window_bounds = array<i64: 16, 32>}, {transform_indices = @transform_9, window_bounds = array<i64: 2, 2, 8, 8>}, {transform_indices = @transform_10, window_bounds = array<i64: 2, 2, 16, 32>}]} {
    %c0 = arith.constant 0 : index
    %c0_0 = arith.constant 0 : index
    %0 = vector.load %arg1[%c0, %c0_0] : memref<16x32xf32, #tpu.memory_space<vmem>>, vector<16x32xf32>
    %c0_1 = arith.constant 0 : index
    %c0_2 = arith.constant 0 : index
    %1 = vector.load %arg8[%c0_1, %c0_2] : memref<1x256xf32, #tpu.memory_space<vmem>>, vector<1x32xf32>
    %c0_3 = arith.constant 0 : index
    %c32 = arith.constant 32 : index
    %2 = vector.load %arg8[%c0_3, %c32] : memref<1x256xf32, #tpu.memory_space<vmem>>, vector<1x32xf32>
    %c0_4 = arith.constant 0 : index
    %c64 = arith.constant 64 : index
    %3 = vector.load %arg8[%c0_4, %c64] : memref<1x256xf32, #tpu.memory_space<vmem>>, vector<1x64xf32>
    %c0_5 = arith.constant 0 : index
    %c128 = arith.constant 128 : index
    %4 = vector.load %arg8[%c0_5, %c128] : memref<1x256xf32, #tpu.memory_space<vmem>>, vector<1x32xf32>
    %c0_6 = arith.constant 0 : index
    %c160 = arith.constant 160 : index
    %5 = vector.load %arg8[%c0_6, %c160] : memref<1x256xf32, #tpu.memory_space<vmem>>, vector<1x32xf32>
    %c0_7 = arith.constant 0 : index
    %c192 = arith.constant 192 : index
    %6 = vector.load %arg8[%c0_7, %c192] : memref<1x256xf32, #tpu.memory_space<vmem>>, vector<1x32xf32>
    %c0_8 = arith.constant 0 : index
    %c0_9 = arith.constant 0 : index
    %7 = vector.load %arg2[%c0_8, %c0_9] : memref<32x128xf32, #tpu.memory_space<vmem>>, vector<32x128xf32>
    %cst = arith.constant dense<0.000000e+00> : vector<16x128xf32>
    %8 = tpu.matmul %0, %7, %cst {dimension_numbers = #tpu.dot_dimension_numbers<[1], [0], [0], [1], [0, 0, 1, 1], [], []>} : vector<16x32xf32>, vector<32x128xf32>, vector<16x128xf32> -> vector<16x128xf32>
    %cst_10 = arith.constant 0.000000e+00 : f32
    %9 = vector.broadcast %cst_10 : f32 to vector<8x32xf32>
    %10 = vector.extract_strided_slice %8 {offsets = [0, 0], sizes = [8, 16], strides = [1, 1]} : vector<16x128xf32> to vector<8x16xf32>
    %11 = vector.extract_strided_slice %8 {offsets = [0, 32], sizes = [8, 16], strides = [1, 1]} : vector<16x128xf32> to vector<8x16xf32>
    %12 = vector.extract_strided_slice %8 {offsets = [0, 64], sizes = [8, 32], strides = [1, 1]} : vector<16x128xf32> to vector<8x32xf32>
    %cst_11 = arith.constant dense<0.000000e+00> : vector<8x8xf32>
    %13 = tpu.matmul %10, %11, %cst_11 {dimension_numbers = #tpu.dot_dimension_numbers<[1], [1], [0], [0], [0, 0, 1, 0], [], []>} : vector<8x16xf32>, vector<8x16xf32>, vector<8x8xf32> -> vector<8x8xf32>
    %cst_12 = arith.constant dense<0xFF800000> : vector<8xf32>
    %14 = vector.multi_reduction <maximumf>, %13, %cst_12 [1] : vector<8x8xf32> to vector<8xf32>
    %15 = vector.shape_cast %14 : vector<8xf32> to vector<8x1xf32>
    %16 = vector.broadcast %15 : vector<8x1xf32> to vector<8x8xf32>
    %17 = arith.subf %13, %16 : vector<8x8xf32>
    %18 = math.exp %17 : vector<8x8xf32>
    %cst_13 = arith.constant dense<0.000000e+00> : vector<8xf32>
    %19 = vector.multi_reduction <add>, %18, %cst_13 [1] : vector<8x8xf32> to vector<8xf32>
    %20 = vector.shape_cast %19 : vector<8xf32> to vector<8x1xf32>
    %21 = vector.broadcast %20 : vector<8x1xf32> to vector<8x8xf32>
    %22 = arith.divf %18, %21 : vector<8x8xf32>
    %cst_14 = arith.constant dense<0.000000e+00> : vector<16x32xf32>
    %23 = tpu.matmul %11, %12, %cst_14 {dimension_numbers = #tpu.dot_dimension_numbers<[0], [0], [1], [1], [0, 1, 1, 1], [], []>} : vector<8x16xf32>, vector<8x32xf32>, vector<16x32xf32> -> vector<16x32xf32>
    %cst_15 = arith.constant dense<0xFF800000> : vector<16xf32>
    %24 = vector.multi_reduction <maximumf>, %23, %cst_15 [1] : vector<16x32xf32> to vector<16xf32>
    %25 = vector.shape_cast %24 : vector<16xf32> to vector<16x1xf32>
    %26 = vector.broadcast %25 : vector<16x1xf32> to vector<16x32xf32>
    %27 = arith.subf %23, %26 : vector<16x32xf32>
    %28 = math.exp %27 : vector<16x32xf32>
    %cst_16 = arith.constant dense<0.000000e+00> : vector<16xf32>
    %29 = vector.multi_reduction <add>, %28, %cst_16 [1] : vector<16x32xf32> to vector<16xf32>
    %30 = vector.shape_cast %29 : vector<16xf32> to vector<16x1xf32>
    %31 = vector.broadcast %30 : vector<16x1xf32> to vector<16x32xf32>
    %32 = arith.divf %28, %31 : vector<16x32xf32>
    %cst_17 = arith.constant dense<0.000000e+00> : vector<8x32xf32>
    %33 = tpu.matmul %22, %12, %cst_17 {dimension_numbers = #tpu.dot_dimension_numbers<[1], [0], [0], [1], [0, 0, 1, 1], [], []>} : vector<8x8xf32>, vector<8x32xf32>, vector<8x32xf32> -> vector<8x32xf32>
    %cst_18 = arith.constant dense<0.000000e+00> : vector<8x32xf32>
    %34 = tpu.matmul %10, %32, %cst_18 {dimension_numbers = #tpu.dot_dimension_numbers<[1], [0], [0], [1], [0, 0, 1, 1], [], []>} : vector<8x16xf32>, vector<16x32xf32>, vector<8x32xf32> -> vector<8x32xf32>
    %c0_19 = arith.constant 0 : index
    %c0_20 = arith.constant 0 : index
    %35 = vector.load %arg3[%c0_19, %c0_20] : memref<64x32xf32, #tpu.memory_space<vmem>>, vector<32x32xf32>
    %cst_21 = arith.constant dense<0.000000e+00> : vector<8x32xf32>
    %36 = tpu.matmul %33, %35, %cst_21 {dimension_numbers = #tpu.dot_dimension_numbers<[1], [0], [0], [1], [0, 0, 1, 1], [], []>} : vector<8x32xf32>, vector<32x32xf32>, vector<8x32xf32> -> vector<8x32xf32>
    %37 = arith.addf %9, %36 : vector<8x32xf32>
    %38 = vector.extract_strided_slice %8 {offsets = [0, 16], sizes = [8, 16], strides = [1, 1]} : vector<16x128xf32> to vector<8x16xf32>
    %39 = vector.extract_strided_slice %8 {offsets = [0, 48], sizes = [8, 16], strides = [1, 1]} : vector<16x128xf32> to vector<8x16xf32>
    %40 = vector.extract_strided_slice %8 {offsets = [0, 96], sizes = [8, 32], strides = [1, 1]} : vector<16x128xf32> to vector<8x32xf32>
    %cst_22 = arith.constant dense<0.000000e+00> : vector<8x8xf32>
    %41 = tpu.matmul %38, %39, %cst_22 {dimension_numbers = #tpu.dot_dimension_numbers<[1], [1], [0], [0], [0, 0, 1, 0], [], []>} : vector<8x16xf32>, vector<8x16xf32>, vector<8x8xf32> -> vector<8x8xf32>
    %cst_23 = arith.constant dense<0xFF800000> : vector<8xf32>
    %42 = vector.multi_reduction <maximumf>, %41, %cst_23 [1] : vector<8x8xf32> to vector<8xf32>
    %43 = vector.shape_cast %42 : vector<8xf32> to vector<8x1xf32>
    %44 = vector.broadcast %43 : vector<8x1xf32> to vector<8x8xf32>
    %45 = arith.subf %41, %44 : vector<8x8xf32>
    %46 = math.exp %45 : vector<8x8xf32>
    %cst_24 = arith.constant dense<0.000000e+00> : vector<8xf32>
    %47 = vector.multi_reduction <add>, %46, %cst_24 [1] : vector<8x8xf32> to vector<8xf32>
    %48 = vector.shape_cast %47 : vector<8xf32> to vector<8x1xf32>
    %49 = vector.broadcast %48 : vector<8x1xf32> to vector<8x8xf32>
    %50 = arith.divf %46, %49 : vector<8x8xf32>
    %cst_25 = arith.constant dense<0.000000e+00> : vector<16x32xf32>
    %51 = tpu.matmul %39, %40, %cst_25 {dimension_numbers = #tpu.dot_dimension_numbers<[0], [0], [1], [1], [0, 1, 1, 1], [], []>} : vector<8x16xf32>, vector<8x32xf32>, vector<16x32xf32> -> vector<16x32xf32>
    %cst_26 = arith.constant dense<0xFF800000> : vector<16xf32>
    %52 = vector.multi_reduction <maximumf>, %51, %cst_26 [1] : vector<16x32xf32> to vector<16xf32>
    %53 = vector.shape_cast %52 : vector<16xf32> to vector<16x1xf32>
    %54 = vector.broadcast %53 : vector<16x1xf32> to vector<16x32xf32>
    %55 = arith.subf %51, %54 : vector<16x32xf32>
    %56 = math.exp %55 : vector<16x32xf32>
    %cst_27 = arith.constant dense<0.000000e+00> : vector<16xf32>
    %57 = vector.multi_reduction <add>, %56, %cst_27 [1] : vector<16x32xf32> to vector<16xf32>
    %58 = vector.shape_cast %57 : vector<16xf32> to vector<16x1xf32>
    %59 = vector.broadcast %58 : vector<16x1xf32> to vector<16x32xf32>
    %60 = arith.divf %56, %59 : vector<16x32xf32>
    %cst_28 = arith.constant dense<0.000000e+00> : vector<8x32xf32>
    %61 = tpu.matmul %50, %40, %cst_28 {dimension_numbers = #tpu.dot_dimension_numbers<[1], [0], [0], [1], [0, 0, 1, 1], [], []>} : vector<8x8xf32>, vector<8x32xf32>, vector<8x32xf32> -> vector<8x32xf32>
    %cst_29 = arith.constant dense<0.000000e+00> : vector<8x32xf32>
    %62 = tpu.matmul %38, %60, %cst_29 {dimension_numbers = #tpu.dot_dimension_numbers<[1], [0], [0], [1], [0, 0, 1, 1], [], []>} : vector<8x16xf32>, vector<16x32xf32>, vector<8x32xf32> -> vector<8x32xf32>
    %c32_30 = arith.constant 32 : index
    %c0_31 = arith.constant 0 : index
    %63 = vector.load %arg3[%c32_30, %c0_31] : memref<64x32xf32, #tpu.memory_space<vmem>>, vector<32x32xf32>
    %cst_32 = arith.constant dense<0.000000e+00> : vector<8x32xf32>
    %64 = tpu.matmul %61, %63, %cst_32 {dimension_numbers = #tpu.dot_dimension_numbers<[1], [0], [0], [1], [0, 0, 1, 1], [], []>} : vector<8x32xf32>, vector<32x32xf32>, vector<8x32xf32> -> vector<8x32xf32>
    %65 = arith.addf %37, %64 : vector<8x32xf32>
    %66 = tpu.concatenate %34, %62 in 0 : vector<8x32xf32>, vector<8x32xf32> -> vector<16x32xf32>
    %c0_33 = arith.constant 0 : index
    %c0_34 = arith.constant 0 : index
    %67 = vector.load %arg4[%c0_33, %c0_34] : memref<8x16xf32, #tpu.memory_space<vmem>>, vector<8x16xf32>
    %cst_35 = arith.constant dense<0.000000e+00> : vector<8x32xf32>
    %68 = tpu.matmul %67, %66, %cst_35 {dimension_numbers = #tpu.dot_dimension_numbers<[1], [0], [0], [1], [0, 0, 1, 1], [], []>} : vector<8x16xf32>, vector<16x32xf32>, vector<8x32xf32> -> vector<8x32xf32>
    %69 = vector.shape_cast %22 : vector<8x8xf32> to vector<1x8x8xf32>
    %70 = vector.shape_cast %50 : vector<8x8xf32> to vector<1x8x8xf32>
    %71 = tpu.concatenate %69, %70 in 0 : vector<1x8x8xf32>, vector<1x8x8xf32> -> vector<2x8x8xf32>
    %72 = vector.shape_cast %32 : vector<16x32xf32> to vector<1x16x32xf32>
    %73 = vector.shape_cast %60 : vector<16x32xf32> to vector<1x16x32xf32>
    %74 = tpu.concatenate %72, %73 in 0 : vector<1x16x32xf32>, vector<1x16x32xf32> -> vector<2x16x32xf32>
    %cst_36 = arith.constant 0.000000e+00 : f32
    %75 = vector.broadcast %cst_36 : f32 to vector<8x32xf32>
    %76 = vector.extract_strided_slice %8 {offsets = [8, 0], sizes = [8, 16], strides = [1, 1]} : vector<16x128xf32> to vector<8x16xf32>
    %77 = vector.extract_strided_slice %8 {offsets = [8, 32], sizes = [8, 16], strides = [1, 1]} : vector<16x128xf32> to vector<8x16xf32>
    %78 = vector.extract_strided_slice %8 {offsets = [8, 64], sizes = [8, 32], strides = [1, 1]} : vector<16x128xf32> to vector<8x32xf32>
    %cst_37 = arith.constant dense<0.000000e+00> : vector<8x8xf32>
    %79 = tpu.matmul %76, %77, %cst_37 {dimension_numbers = #tpu.dot_dimension_numbers<[1], [1], [0], [0], [0, 0, 1, 0], [], []>} : vector<8x16xf32>, vector<8x16xf32>, vector<8x8xf32> -> vector<8x8xf32>
    %cst_38 = arith.constant dense<0xFF800000> : vector<8xf32>
    %80 = vector.multi_reduction <maximumf>, %79, %cst_38 [1] : vector<8x8xf32> to vector<8xf32>
    %81 = vector.shape_cast %80 : vector<8xf32> to vector<8x1xf32>
    %82 = vector.broadcast %81 : vector<8x1xf32> to vector<8x8xf32>
    %83 = arith.subf %79, %82 : vector<8x8xf32>
    %84 = math.exp %83 : vector<8x8xf32>
    %cst_39 = arith.constant dense<0.000000e+00> : vector<8xf32>
    %85 = vector.multi_reduction <add>, %84, %cst_39 [1] : vector<8x8xf32> to vector<8xf32>
    %86 = vector.shape_cast %85 : vector<8xf32> to vector<8x1xf32>
    %87 = vector.broadcast %86 : vector<8x1xf32> to vector<8x8xf32>
    %88 = arith.divf %84, %87 : vector<8x8xf32>
    %cst_40 = arith.constant dense<0.000000e+00> : vector<16x32xf32>
    %89 = tpu.matmul %77, %78, %cst_40 {dimension_numbers = #tpu.dot_dimension_numbers<[0], [0], [1], [1], [0, 1, 1, 1], [], []>} : vector<8x16xf32>, vector<8x32xf32>, vector<16x32xf32> -> vector<16x32xf32>
    %cst_41 = arith.constant dense<0xFF800000> : vector<16xf32>
    %90 = vector.multi_reduction <maximumf>, %89, %cst_41 [1] : vector<16x32xf32> to vector<16xf32>
    %91 = vector.shape_cast %90 : vector<16xf32> to vector<16x1xf32>
    %92 = vector.broadcast %91 : vector<16x1xf32> to vector<16x32xf32>
    %93 = arith.subf %89, %92 : vector<16x32xf32>
    %94 = math.exp %93 : vector<16x32xf32>
    %cst_42 = arith.constant dense<0.000000e+00> : vector<16xf32>
    %95 = vector.multi_reduction <add>, %94, %cst_42 [1] : vector<16x32xf32> to vector<16xf32>
    %96 = vector.shape_cast %95 : vector<16xf32> to vector<16x1xf32>
    %97 = vector.broadcast %96 : vector<16x1xf32> to vector<16x32xf32>
    %98 = arith.divf %94, %97 : vector<16x32xf32>
    %cst_43 = arith.constant dense<0.000000e+00> : vector<8x32xf32>
    %99 = tpu.matmul %88, %78, %cst_43 {dimension_numbers = #tpu.dot_dimension_numbers<[1], [0], [0], [1], [0, 0, 1, 1], [], []>} : vector<8x8xf32>, vector<8x32xf32>, vector<8x32xf32> -> vector<8x32xf32>
    %cst_44 = arith.constant dense<0.000000e+00> : vector<8x32xf32>
    %100 = tpu.matmul %76, %98, %cst_44 {dimension_numbers = #tpu.dot_dimension_numbers<[1], [0], [0], [1], [0, 0, 1, 1], [], []>} : vector<8x16xf32>, vector<16x32xf32>, vector<8x32xf32> -> vector<8x32xf32>
    %c0_45 = arith.constant 0 : index
    %c0_46 = arith.constant 0 : index
    %101 = vector.load %arg3[%c0_45, %c0_46] : memref<64x32xf32, #tpu.memory_space<vmem>>, vector<32x32xf32>
    %cst_47 = arith.constant dense<0.000000e+00> : vector<8x32xf32>
    %102 = tpu.matmul %99, %101, %cst_47 {dimension_numbers = #tpu.dot_dimension_numbers<[1], [0], [0], [1], [0, 0, 1, 1], [], []>} : vector<8x32xf32>, vector<32x32xf32>, vector<8x32xf32> -> vector<8x32xf32>
    %103 = arith.addf %75, %102 : vector<8x32xf32>
    %104 = vector.extract_strided_slice %8 {offsets = [8, 16], sizes = [8, 16], strides = [1, 1]} : vector<16x128xf32> to vector<8x16xf32>
    %105 = vector.extract_strided_slice %8 {offsets = [8, 48], sizes = [8, 16], strides = [1, 1]} : vector<16x128xf32> to vector<8x16xf32>
    %106 = vector.extract_strided_slice %8 {offsets = [8, 96], sizes = [8, 32], strides = [1, 1]} : vector<16x128xf32> to vector<8x32xf32>
    %cst_48 = arith.constant dense<0.000000e+00> : vector<8x8xf32>
    %107 = tpu.matmul %104, %105, %cst_48 {dimension_numbers = #tpu.dot_dimension_numbers<[1], [1], [0], [0], [0, 0, 1, 0], [], []>} : vector<8x16xf32>, vector<8x16xf32>, vector<8x8xf32> -> vector<8x8xf32>
    %cst_49 = arith.constant dense<0xFF800000> : vector<8xf32>
    %108 = vector.multi_reduction <maximumf>, %107, %cst_49 [1] : vector<8x8xf32> to vector<8xf32>
    %109 = vector.shape_cast %108 : vector<8xf32> to vector<8x1xf32>
    %110 = vector.broadcast %109 : vector<8x1xf32> to vector<8x8xf32>
    %111 = arith.subf %107, %110 : vector<8x8xf32>
    %112 = math.exp %111 : vector<8x8xf32>
    %cst_50 = arith.constant dense<0.000000e+00> : vector<8xf32>
    %113 = vector.multi_reduction <add>, %112, %cst_50 [1] : vector<8x8xf32> to vector<8xf32>
    %114 = vector.shape_cast %113 : vector<8xf32> to vector<8x1xf32>
    %115 = vector.broadcast %114 : vector<8x1xf32> to vector<8x8xf32>
    %116 = arith.divf %112, %115 : vector<8x8xf32>
    %cst_51 = arith.constant dense<0.000000e+00> : vector<16x32xf32>
    %117 = tpu.matmul %105, %106, %cst_51 {dimension_numbers = #tpu.dot_dimension_numbers<[0], [0], [1], [1], [0, 1, 1, 1], [], []>} : vector<8x16xf32>, vector<8x32xf32>, vector<16x32xf32> -> vector<16x32xf32>
    %cst_52 = arith.constant dense<0xFF800000> : vector<16xf32>
    %118 = vector.multi_reduction <maximumf>, %117, %cst_52 [1] : vector<16x32xf32> to vector<16xf32>
    %119 = vector.shape_cast %118 : vector<16xf32> to vector<16x1xf32>
    %120 = vector.broadcast %119 : vector<16x1xf32> to vector<16x32xf32>
    %121 = arith.subf %117, %120 : vector<16x32xf32>
    %122 = math.exp %121 : vector<16x32xf32>
    %cst_53 = arith.constant dense<0.000000e+00> : vector<16xf32>
    %123 = vector.multi_reduction <add>, %122, %cst_53 [1] : vector<16x32xf32> to vector<16xf32>
    %124 = vector.shape_cast %123 : vector<16xf32> to vector<16x1xf32>
    %125 = vector.broadcast %124 : vector<16x1xf32> to vector<16x32xf32>
    %126 = arith.divf %122, %125 : vector<16x32xf32>
    %cst_54 = arith.constant dense<0.000000e+00> : vector<8x32xf32>
    %127 = tpu.matmul %116, %106, %cst_54 {dimension_numbers = #tpu.dot_dimension_numbers<[1], [0], [0], [1], [0, 0, 1, 1], [], []>} : vector<8x8xf32>, vector<8x32xf32>, vector<8x32xf32> -> vector<8x32xf32>
    %cst_55 = arith.constant dense<0.000000e+00> : vector<8x32xf32>
    %128 = tpu.matmul %104, %126, %cst_55 {dimension_numbers = #tpu.dot_dimension_numbers<[1], [0], [0], [1], [0, 0, 1, 1], [], []>} : vector<8x16xf32>, vector<16x32xf32>, vector<8x32xf32> -> vector<8x32xf32>
    %c32_56 = arith.constant 32 : index
    %c0_57 = arith.constant 0 : index
    %129 = vector.load %arg3[%c32_56, %c0_57] : memref<64x32xf32, #tpu.memory_space<vmem>>, vector<32x32xf32>
    %cst_58 = arith.constant dense<0.000000e+00> : vector<8x32xf32>
    %130 = tpu.matmul %127, %129, %cst_58 {dimension_numbers = #tpu.dot_dimension_numbers<[1], [0], [0], [1], [0, 0, 1, 1], [], []>} : vector<8x32xf32>, vector<32x32xf32>, vector<8x32xf32> -> vector<8x32xf32>
    %131 = arith.addf %103, %130 : vector<8x32xf32>
    %132 = tpu.concatenate %100, %128 in 0 : vector<8x32xf32>, vector<8x32xf32> -> vector<16x32xf32>
    %c0_59 = arith.constant 0 : index
    %c0_60 = arith.constant 0 : index
    %133 = vector.load %arg4[%c0_59, %c0_60] : memref<8x16xf32, #tpu.memory_space<vmem>>, vector<8x16xf32>
    %cst_61 = arith.constant dense<0.000000e+00> : vector<8x32xf32>
    %134 = tpu.matmul %133, %132, %cst_61 {dimension_numbers = #tpu.dot_dimension_numbers<[1], [0], [0], [1], [0, 0, 1, 1], [], []>} : vector<8x16xf32>, vector<16x32xf32>, vector<8x32xf32> -> vector<8x32xf32>
    %135 = vector.shape_cast %88 : vector<8x8xf32> to vector<1x8x8xf32>
    %136 = vector.shape_cast %116 : vector<8x8xf32> to vector<1x8x8xf32>
    %137 = tpu.concatenate %135, %136 in 0 : vector<1x8x8xf32>, vector<1x8x8xf32> -> vector<2x8x8xf32>
    %138 = vector.shape_cast %98 : vector<16x32xf32> to vector<1x16x32xf32>
    %139 = vector.shape_cast %126 : vector<16x32xf32> to vector<1x16x32xf32>
    %140 = tpu.concatenate %138, %139 in 0 : vector<1x16x32xf32>, vector<1x16x32xf32> -> vector<2x16x32xf32>
    %141 = vector.shape_cast %71 : vector<2x8x8xf32> to vector<1x2x8x8xf32>
    %142 = vector.shape_cast %137 : vector<2x8x8xf32> to vector<1x2x8x8xf32>
    %143 = tpu.concatenate %141, %142 in 0 : vector<1x2x8x8xf32>, vector<1x2x8x8xf32> -> vector<2x2x8x8xf32>
    %c0_62 = arith.constant 0 : index
    %c0_63 = arith.constant 0 : index
    %c0_64 = arith.constant 0 : index
    %c0_65 = arith.constant 0 : index
    %144 = vector.load %arg10[%c0_62, %c0_63, %c0_64, %c0_65] : memref<2x2x8x8xf32, #tpu.memory_space<vmem>>, vector<2x2x8x8xf32>
    tpu.vector_store %arg10[%c0_62, %c0_63, %c0_64, %c0_65], %143 {strides = array<i32>} : memref<2x2x8x8xf32, #tpu.memory_space<vmem>>, vector<2x2x8x8xf32>,
    %145 = vector.shape_cast %74 : vector<2x16x32xf32> to vector<1x2x16x32xf32>
    %146 = vector.shape_cast %140 : vector<2x16x32xf32> to vector<1x2x16x32xf32>
    %147 = tpu.concatenate %145, %146 in 0 : vector<1x2x16x32xf32>, vector<1x2x16x32xf32> -> vector<2x2x16x32xf32>
    %c0_66 = arith.constant 0 : index
    %c0_67 = arith.constant 0 : index
    %c0_68 = arith.constant 0 : index
    %c0_69 = arith.constant 0 : index
    %148 = vector.load %arg11[%c0_66, %c0_67, %c0_68, %c0_69] : memref<2x2x16x32xf32, #tpu.memory_space<vmem>>, vector<2x2x16x32xf32>
    tpu.vector_store %arg11[%c0_66, %c0_67, %c0_68, %c0_69], %147 {strides = array<i32>} : memref<2x2x16x32xf32, #tpu.memory_space<vmem>>, vector<2x2x16x32xf32>,
    %149 = tpu.concatenate %65, %131 in 0 : vector<8x32xf32>, vector<8x32xf32> -> vector<16x32xf32>
    %150 = tpu.concatenate %68, %134 in 0 : vector<8x32xf32>, vector<8x32xf32> -> vector<16x32xf32>
    %c0_70 = arith.constant 0 : index
    %c0_71 = arith.constant 0 : index
    %151 = vector.load %arg5[%c0_70, %c0_71] : memref<32x32xf32, #tpu.memory_space<vmem>>, vector<32x32xf32>
    %cst_72 = arith.constant dense<0.000000e+00> : vector<16x32xf32>
    %152 = tpu.matmul %150, %151, %cst_72 {dimension_numbers = #tpu.dot_dimension_numbers<[1], [0], [0], [1], [0, 0, 1, 1], [], []>} : vector<16x32xf32>, vector<32x32xf32>, vector<16x32xf32> -> vector<16x32xf32>
    %153 = arith.addf %149, %152 : vector<16x32xf32>
    %154 = arith.addf %153, %0 : vector<16x32xf32>
    %cst_73 = arith.constant dense<0.000000e+00> : vector<16xf32>
    %155 = vector.multi_reduction <add>, %154, %cst_73 [1] : vector<16x32xf32> to vector<16xf32>
    %156 = vector.shape_cast %155 : vector<16xf32> to vector<16x1xf32>
    %cst_74 = arith.constant 3.200000e+01 : f32
    %157 = vector.broadcast %cst_74 : f32 to vector<16x1xf32>
    %158 = arith.divf %156, %157 : vector<16x1xf32>
    %159 = vector.broadcast %158 : vector<16x1xf32> to vector<16x32xf32>
    %160 = arith.subf %154, %159 : vector<16x32xf32>
    %161 = arith.mulf %160, %160 : vector<16x32xf32>
    %cst_75 = arith.constant dense<0.000000e+00> : vector<16xf32>
    %162 = vector.multi_reduction <add>, %161, %cst_75 [1] : vector<16x32xf32> to vector<16xf32>
    %163 = vector.shape_cast %162 : vector<16xf32> to vector<16x1xf32>
    %cst_76 = arith.constant 3.200000e+01 : f32
    %164 = vector.broadcast %cst_76 : f32 to vector<16x1xf32>
    %165 = arith.divf %163, %164 : vector<16x1xf32>
    %166 = vector.broadcast %158 : vector<16x1xf32> to vector<16x32xf32>
    %167 = arith.subf %154, %166 : vector<16x32xf32>
    %cst_77 = arith.constant 9.99999997E-7 : f32
    %168 = vector.broadcast %cst_77 : f32 to vector<16x1xf32>
    %169 = arith.addf %165, %168 : vector<16x1xf32>
    %170 = math.rsqrt %169 : vector<16x1xf32>
    %171 = vector.broadcast %170 : vector<16x1xf32> to vector<16x32xf32>
    %172 = arith.mulf %167, %171 : vector<16x32xf32>
    %173 = vector.broadcast %1 : vector<1x32xf32> to vector<16x32xf32>
    %174 = arith.mulf %172, %173 : vector<16x32xf32>
    %175 = vector.broadcast %2 : vector<1x32xf32> to vector<16x32xf32>
    %176 = arith.addf %174, %175 : vector<16x32xf32>
    %c0_78 = arith.constant 0 : index
    %c0_79 = arith.constant 0 : index
    %177 = vector.load %arg6[%c0_78, %c0_79] : memref<32x64xf32, #tpu.memory_space<vmem>>, vector<32x64xf32>
    %cst_80 = arith.constant dense<0.000000e+00> : vector<16x64xf32>
    %178 = tpu.matmul %176, %177, %cst_80 {dimension_numbers = #tpu.dot_dimension_numbers<[1], [0], [0], [1], [0, 0, 1, 1], [], []>} : vector<16x32xf32>, vector<32x64xf32>, vector<16x64xf32> -> vector<16x64xf32>
    %179 = vector.broadcast %3 : vector<1x64xf32> to vector<16x64xf32>
    %180 = arith.addf %178, %179 : vector<16x64xf32>
    %cst_81 = arith.constant 0.000000e+00 : f32
    %181 = vector.broadcast %cst_81 : f32 to vector<16x64xf32>
    %182 = arith.maximumf %180, %181 : vector<16x64xf32>
    %c0_82 = arith.constant 0 : index
    %c0_83 = arith.constant 0 : index
    %183 = vector.load %arg7[%c0_82, %c0_83] : memref<64x32xf32, #tpu.memory_space<vmem>>, vector<64x32xf32>
    %cst_84 = arith.constant dense<0.000000e+00> : vector<16x32xf32>
    %184 = tpu.matmul %182, %183, %cst_84 {dimension_numbers = #tpu.dot_dimension_numbers<[1], [0], [0], [1], [0, 0, 1, 1], [], []>} : vector<16x64xf32>, vector<64x32xf32>, vector<16x32xf32> -> vector<16x32xf32>
    %185 = vector.broadcast %4 : vector<1x32xf32> to vector<16x32xf32>
    %186 = arith.addf %184, %185 : vector<16x32xf32>
    %187 = arith.addf %186, %176 : vector<16x32xf32>
    %cst_85 = arith.constant dense<0.000000e+00> : vector<16xf32>
    %188 = vector.multi_reduction <add>, %187, %cst_85 [1] : vector<16x32xf32> to vector<16xf32>
    %189 = vector.shape_cast %188 : vector<16xf32> to vector<16x1xf32>
    %cst_86 = arith.constant 3.200000e+01 : f32
    %190 = vector.broadcast %cst_86 : f32 to vector<16x1xf32>
    %191 = arith.divf %189, %190 : vector<16x1xf32>
    %192 = vector.broadcast %191 : vector<16x1xf32> to vector<16x32xf32>
    %193 = arith.subf %187, %192 : vector<16x32xf32>
    %194 = arith.mulf %193, %193 : vector<16x32xf32>
    %cst_87 = arith.constant dense<0.000000e+00> : vector<16xf32>
    %195 = vector.multi_reduction <add>, %194, %cst_87 [1] : vector<16x32xf32> to vector<16xf32>
    %196 = vector.shape_cast %195 : vector<16xf32> to vector<16x1xf32>
    %cst_88 = arith.constant 3.200000e+01 : f32
    %197 = vector.broadcast %cst_88 : f32 to vector<16x1xf32>
    %198 = arith.divf %196, %197 : vector<16x1xf32>
    %199 = vector.broadcast %191 : vector<16x1xf32> to vector<16x32xf32>
    %200 = arith.subf %187, %199 : vector<16x32xf32>
    %cst_89 = arith.constant 9.99999997E-7 : f32
    %201 = vector.broadcast %cst_89 : f32 to vector<16x1xf32>
    %202 = arith.addf %198, %201 : vector<16x1xf32>
    %203 = math.rsqrt %202 : vector<16x1xf32>
    %204 = vector.broadcast %203 : vector<16x1xf32> to vector<16x32xf32>
    %205 = arith.mulf %200, %204 : vector<16x32xf32>
    %206 = vector.broadcast %5 : vector<1x32xf32> to vector<16x32xf32>
    %207 = arith.mulf %205, %206 : vector<16x32xf32>
    %208 = vector.broadcast %6 : vector<1x32xf32> to vector<16x32xf32>
    %209 = arith.addf %207, %208 : vector<16x32xf32>
    %c0_90 = arith.constant 0 : index
    %c0_91 = arith.constant 0 : index
    %210 = vector.load %arg9[%c0_90, %c0_91] : memref<16x32xf32, #tpu.memory_space<vmem>>, vector<16x32xf32>
    tpu.vector_store %arg9[%c0_90, %c0_91], %209 {strides = array<i32>} : memref<16x32xf32, #tpu.memory_space<vmem>>, vector<16x32xf32>,
    return
  }
  func.func @transform_0(%arg0: i32) -> (i32, i32) {
    %c0_i32 = arith.constant 0 : i32
    %c0_i32_0 = arith.constant 0 : i32
    return %arg0, %c0_i32 : i32, i32
  }
  func.func @transform_1(%arg0: i32) -> (i32, i32) {
    %c0_i32 = arith.constant 0 : i32
    %c0_i32_0 = arith.constant 0 : i32
    %c0_i32_1 = arith.constant 0 : i32
    return %c0_i32, %c0_i32_0 : i32, i32
  }
  func.func @transform_2(%arg0: i32) -> (i32, i32) {
    %c0_i32 = arith.constant 0 : i32
    %c0_i32_0 = arith.constant 0 : i32
    %c0_i32_1 = arith.constant 0 : i32
    return %c0_i32, %c0_i32_0 : i32, i32
  }
  func.func @transform_3(%arg0: i32) -> (i32, i32) {
    %c0_i32 = arith.constant 0 : i32
    %c0_i32_0 = arith.constant 0 : i32
    %c0_i32_1 = arith.constant 0 : i32
    return %c0_i32, %c0_i32_0 : i32, i32
  }
  func.func @transform_4(%arg0: i32) -> (i32, i32) {
    %c0_i32 = arith.constant 0 : i32
    %c0_i32_0 = arith.constant 0 : i32
    %c0_i32_1 = arith.constant 0 : i32
    return %c0_i32, %c0_i32_0 : i32, i32
  }
  func.func @transform_5(%arg0: i32) -> (i32, i32) {
    %c0_i32 = arith.constant 0 : i32
    %c0_i32_0 = arith.constant 0 : i32
    %c0_i32_1 = arith.constant 0 : i32
    return %c0_i32, %c0_i32_0 : i32, i32
  }
  func.func @transform_6(%arg0: i32) -> (i32, i32) {
    %c0_i32 = arith.constant 0 : i32
    %c0_i32_0 = arith.constant 0 : i32
    %c0_i32_1 = arith.constant 0 : i32
    return %c0_i32, %c0_i32_0 : i32, i32
  }
  func.func @transform_7(%arg0: i32) -> (i32, i32) {
    %c0_i32 = arith.constant 0 : i32
    %c0_i32_0 = arith.constant 0 : i32
    %c0_i32_1 = arith.constant 0 : i32
    return %c0_i32, %c0_i32_0 : i32, i32
  }
  func.func @transform_8(%arg0: i32) -> (i32, i32) {
    %c0_i32 = arith.constant 0 : i32
    %c0_i32_0 = arith.constant 0 : i32
    return %arg0, %c0_i32 : i32, i32
  }
  func.func @transform_9(%arg0: i32) -> (i32, i32, i32, i32) {
    %c0_i32 = arith.constant 0 : i32
    %c0_i32_0 = arith.constant 0 : i32
    %c0_i32_1 = arith.constant 0 : i32
    %c0_i32_2 = arith.constant 0 : i32
    return %arg0, %c0_i32, %c0_i32_0, %c0_i32_1 : i32, i32, i32, i32
  }
  func.func @transform_10(%arg0: i32) -> (i32, i32, i32, i32) {
    %c0_i32 = arith.constant 0 : i32
    %c0_i32_0 = arith.constant 0 : i32
    %c0_i32_1 = arith.constant 0 : i32
    %c0_i32_2 = arith.constant 0 : i32
    return %arg0, %c0_i32, %c0_i32_0, %c0_i32_1 : i32, i32, i32, i32
  }
}

</mosaic_0001>

<bundles_post_ra>
// kernel: tpu_custom_call.1
= control target key start
LH: loop header
LB: loop body
LE: loop exit
PB: predicated region body
PF: predicated region fallthrough
CT: control target
= control target key end

     0   :  { %16 = vsyncpa [#allocation3], 0  ;;  %s1953_s0 = inlined_call_operand.vmem [shape: f32[16,32], index: 0, kind: input, shape index: {}]   ;;  %s1954_s1 = inlined_call_operand.vmem [shape: f32[32,128], index: 1, kind: input, shape index: {}]   ;;  %s1955_s2 = inlined_call_operand.vmem [shape: f32[64,32], index: 2, kind: input, shape index: {}]   ;;  %s1956_s3 = inlined_call_operand.vmem [shape: f32[8,16], index: 3, kind: input, shape index: {}]   ;;  %s1957_s4 = inlined_call_operand.vmem [shape: f32[32,32], index: 4, kind: input, shape index: {}]   ;;  %s1958_s5 = inlined_call_operand.vmem [shape: f32[32,64], index: 5, kind: input, shape index: {}]   ;;  %s1959_s6 = inlined_call_operand.vmem [shape: f32[64,32], index: 6, kind: input, shape index: {}]   ;;  %s1960_s7 = inlined_call_operand.vmem [shape: f32[1,256], index: 7, kind: input, shape index: {}]   ;;  %s1961_s8 = inlined_call_operand.hbm [shape: f32[16,32], index: 8, kind: output, shape index: {0}]   ;;  %s1962_s9 = inlined_call_operand.hbm [shape: f32[2,2,8,8], index: 9, kind: output, shape index: {1}]   ;;  %s1963_s10 = inlined_call_operand.hbm [shape: f32[2,2,16,32], index: 10, kind: output, shape index: {2}]  }
   0x1   :  { %v41_v0 = vld [vmem:[%s1954_s1 + $0x18] sm:$0xff]  ;;  %v40_v1 = vld [vmem:[%s1954_s1 + $0x10] sm:$0xff]  ;;  %v39_v2 = vld [vmem:[%s1954_s1 + $0x8] sm:$0xff] }
   0x2   :  { %61 = vmatpush.msra.mxu0 %v41_v0 }
   0x3   :  { %17 = vsyncpa [#allocation5], 0  ;;  %v38_v3 = vld [vmem:[%s1954_s1] sm:$0xff]  ;;  %vm42_vm0 = vcmask 261120   ;;  %s1534_s23 = smov 112   ;;  %s1535_s24 = smov 80  }
   0x4   :  { %62 = vmatpush.msra.mxu0 %v40_v1  ;;  %v1615_v4 = vld [vmem:[%s1953_s0] sm:$0xff]  ;;  %s1536_s1 = smov 96   ;;  %s1537_s25 = smov 64   ;;  %v1632_v6 = vld [vmem:[%s1953_s0 + $0x8] sm:$0xff]  ;;  %vm75_vm1 = vcmask 130048   ;;  %vm100_vm2 = vcmask 64512  }
   0x5   :  { %s1538_s0 = smov 32   ;;  %v1678_v54 = vld [vmem:[%s1955_s2 + $0x38] sm:$0xff]  ;;  %v1684_v55 = vld [vmem:[%s1955_s2 + $0x30] sm:$0xff]  ;;  %v1690_v56 = vld [vmem:[%s1955_s2 + $0x28] sm:$0xff]  ;;  %s1314_s16 = sshll.u32 %s1962_s9, 4  ;;  %s1315_s16 = int_to_ptr.hbm [resolvable:$true] %s1314_s16 }
   0x6   :  { %63 = vmatpush.msra.mxu0 %v39_v2  ;;  %v1695_v57 = vld [vmem:[%s1955_s2 + $0x20] sm:$0xff]  ;;  %s1541_s17 = smov 128   ;;  %s1542_s18 = smov 8  }
   0x7   :  { %s1543_s19 = smov [#allocation6]   ;;  %s1327_s26 = sshll.u32 %s1963_s10, 4  ;;  %s1328_s26 = int_to_ptr.hbm [resolvable:$true] %s1327_s26 }
   0x8   :  { %64 = vmatpush.msra.mxu0 %v38_v3  ;;  %s1325_s20 = sshll.u32 %s1543_s19, 4  ;;  %s1544_s9 = smov [#allocation2]   ;;  %s1326_s20 = int_to_ptr.vmem [resolvable:$true] %s1325_s20 }
   0x9   :  { %1348 = vmatmul.msk.f32.vlgmr.msra.gmra.mxu0 %vm42_vm0, %v1615_v4  ;;  %s1299_s10 = sshll.u32 %s1544_s9, 4  ;;  %s1300_s10 = int_to_ptr.vmem [resolvable:$true] %s1299_s10 }
  0x11   :  { %1349 = vmatmul.msk.f32.gmra.mxu0 %vm42_vm0, %v1632_v6 }
  0x86   :  { %v1619_v5 = vpop.f32.mrf.mxu0 }
  0x87   :  { %285 = vrot.lane.b32.xlu2 %v1619_v5, %s1534_s23  ;;  %287 = vrot.lane.b32.xlu1 %v1619_v5, %s1535_s24 }
  0x88   :  { %73 = vrot.lane.b32.xlu0 %v1619_v5, %s1536_s1 }
  0x8e   :  { %v1647_v11 = vpop.f32.mrf.mxu0 }
  0x90   :  { %158 = vrot.lane.b32.xlu0 %v1619_v5, %s1537_s25 }
  0xe1   :  { %v1641_v9 = vpop.permute.xlu2 %285 }
  0xf9   :  { %v1636_v7 = vpop.permute.xlu1 %287 }
  0xfa   :  { %v74_v8 = vpop.permute.xlu0 %73  ;;  %1356 = vmatpush.xpose.msk.msra.mxu1 %vm75_vm1, %v1636_v7 }
  0xfb   :  { %1350 = vmatpush.xpose.msk.msrb.mxu0 %vm75_vm1, %v74_v8  ;;  %126 = vxpose.xlu1.b32.start.end [1/1] (short) (narrow) %v74_v8, 16 }
  0xfd   :  { %1357 = vmatmul.msk.f32.vlgmr.msra.gmra.mxu1 %vm75_vm1, %v1641_v9 }
  0xfe   :  { %1351 = vmatmul.msk.f32.vlgmr.msrb.gmra.mxu0 %vm75_vm1, %v1619_v5 }
  0xff   :  { %512 = vmatpush.msra.mxu0 %v1678_v54 }
 0x101   :  { %513 = vmatpush.msra.mxu0 %v1684_v55 }
 0x102   :  { %v159_v10 = vpop.permute.xlu0 %158 }
 0x103   :  { %182 = vmatpush.msra.mxu2 %v159_v10  ;;  %256 = vmatpush.msra.mxu3 %v159_v10 }
 0x104   :  { %514 = vmatpush.msra.mxu0 %v1690_v56 }
 0x106   :  { %515 = vmatpush.msra.mxu0 %v1695_v57 }
 0x17a   :  { %v310_v21 = vpop.f32.mrf.mxu1 }
 0x17b   :  { %v97_v12 = vpop.f32.mrf.mxu0  ;;  %v313_v24 = vsel %vm100_vm2, %v310_v21, -inf }
 0x17c   :  { %v101_v13 = vsel %vm100_vm2, %v97_v12, -inf }
 0x17d   :  { %102 = vmax.xlane.f32.xlu2 %v101_v13 }
 0x19f   :  { %v142_v14 = vpop.trf.xlu1 }
 0x1a0   :  { %1352 = vmatmul.msk.f32.vlgmr.msra.gmra.mxu2 %vm100_vm2, %v142_v14 }
 0x1a7   :  { %v143_v15 = vpop.trf.xlu1 }
 0x1a8   :  { %1353 = vmatmul.msk.f32.gmra.mxu2 %vm100_vm2, %v143_v15 }
 0x1f0   :  { %v103_v16 = vpop.xlane.xlu2 %102 }
 0x1f1   :  { %v104_v17 = vsub.f32 %v97_v12, %v103_v16 }
 0x1f3   :  { %v105_v20 = vmul.f32 1.442695, %v104_v17 }
 0x1f5   :  { %1400 = vpow2.f32 %v105_v20 }
 0x1fb   :  { %v1401_v25 = vpop.eup %1400 }
 0x1fc   :  { %v107_v26 = vsel %vm100_vm2, %v1401_v25, 0.0 }
 0x223   :  { %v184_v18 = vpop.f32.mrf.mxu2 }
 0x224   :  { %v190_v19 = vsel %vm42_vm0, %v184_v18, -inf }
 0x225   :  { %191 = vmax.xlane.f32.xlu2 %v190_v19 }
 0x22b   :  { %v187_v22 = vpop.f32.mrf.mxu2 }
 0x22c   :  { %v193_v23 = vsel %vm42_vm0, %v187_v22, -inf }
 0x22d   :  { %194 = vmax.xlane.f32.xlu0 %v193_v23  ;;  %314 = vmax.xlane.f32.xlu2 %v313_v24 }
 0x235   :  { %108 = vadd.xlane.f32.xlu0 %v107_v26 }
 0x298   :  { %v192_v27 = vpop.xlane.xlu2 %191 }
 0x299   :  { %v196_v28 = vsub.f32 %v184_v18, %v192_v27 }
 0x29b   :  { %v198_v29 = vmul.f32 1.442695, %v196_v28 }
 0x29d   :  { %1402 = vpow2.f32 %v198_v29 }
 0x2a0   :  { %v195_v30 = vpop.xlane.xlu0 %194  ;;  %v315_v31 = vpop.xlane.xlu2 %314 }
 0x2a1   :  { %v197_v32 = vsub.f32 %v187_v22, %v195_v30  ;;  %v316_v33 = vsub.f32 %v310_v21, %v315_v31 }
 0x2a3   :  { %v1656_v34 = vpop.eup %1402  ;;  %v200_v35 = vmul.f32 1.442695, %v197_v32  ;;  %v317_v36 = vmul.f32 1.442695, %v316_v33 }
 0x2a4   :  { %v202_v37 = vsel %vm42_vm0, %v1656_v34, 0.0 }
 0x2a5   :  { %1404 = vpow2.f32 %v200_v35  ;;  %203 = vadd.xlane.f32.xlu2 %v202_v37  ;;  %v1709_v37 = vld [vmem:[%s1955_s2 + $0x18] sm:$0xff] }
 0x2a6   :  { %1406 = vpow2.f32 %v317_v36 }
 0x2a8   :  { %v109_v38 = vpop.xlane.xlu0 %108 }
 0x2a9   :  { %1408 = vrcp.f32 %v109_v38  ;;  %v121_v46 = vand.u32 2147483648, %v109_v38  ;;  %v119_v48 = vand.u32 2147483647, %v109_v38  ;;  %vm115_vm4 = vweird.f32 %v109_v38 }
 0x2ab   :  { %v1660_v39 = vpop.eup %1404  ;;  %v122_v50 = vor.u32 1.1754944e-38, %v121_v46  ;;  %vm120_vm6 = vcmp.eq.f32.partialorder %v119_v48, 8.507059e+37 }
 0x2ac   :  { %v1662_v40 = vpop.eup %1406  ;;  %v205_v41 = vsel %vm42_vm0, %v1660_v39, 0.0 }
 0x2ad   :  { %206 = vadd.xlane.f32.xlu1 %v205_v41  ;;  %v319_v42 = vsel %vm100_vm2, %v1662_v40, 0.0 }
 0x2ae   :  { %320 = vadd.xlane.f32.xlu0 %v319_v42 }
 0x2af   :  { %v1409_v43 = vpop.eup %1408 }
 0x2b0   :  { %v111_v44 = vmul.f32 %v1409_v43, %v109_v38  ;;  %vm116_vm3 = vweird.f32 %v1409_v43  ;;  %v1716_v38 = vld [vmem:[%s1955_s2 + $0x10] sm:$0xff] }
 0x2b1   :  { %vm117_vm5 = vmor %vm115_vm4, %vm116_vm3 }
 0x2b2   :  { %v112_v45 = vsub.f32 1.0, %v111_v44 }
 0x2b4   :  { %v113_v47 = vmul.f32 %v1409_v43, %v112_v45 }
 0x2b6   :  { %v114_v49 = vadd.f32 %v1409_v43, %v113_v47 }
 0x2b8   :  { %v118_v51 = vsel %vm117_vm5, %v1409_v43, %v114_v49 }
 0x2b9   :  { %v123_v52 = vsel %vm120_vm6, %v122_v50, %v118_v51 }
 0x2ba   :  { %v124_v53 = vmul.f32 %v1401_v25, %v123_v52 }
 0x2bc   :  { %1354 = vmatmul.msk.f32.vlgmr.msra.gmra.mxu3 %vm100_vm2, %v124_v53  ;;  %1048 = vst.msk [vmem:[#allocation4] sm:$0xff] %vm100_vm2, %v124_v53 }
 0x2bd   :  { %370 = vrot.lane.b32.xlu2 %v1619_v5, %s1538_s0 }
 0x2c2   :  { %568 = vrot.lane.b32.xlu0 %v1647_v11, %s1536_s1 }
 0x2c6   :  { %859 = vrot.lane.b32.xlu1 %v1647_v11, %s1538_s0 }
 0x2e4   :  { %338 = vxpose.xlu0.b32.start.end [1/1] (short) (narrow) %v1636_v7, 16 }
 0x318   :  { %v204_v58 = vpop.xlane.xlu2 %203 }
 0x319   :  { %1410 = vrcp.f32 %v204_v58  ;;  %v219_v1 = vand.u32 2147483648, %v204_v58  ;;  %v217_v3 = vand.u32 2147483647, %v204_v58  ;;  %vm213_vm8 = vweird.f32 %v204_v58 }
 0x31b   :  { %v220_v10 = vor.u32 1.1754944e-38, %v219_v1  ;;  %vm218_vm10 = vcmp.eq.f32.partialorder %v217_v3, 8.507059e+37 }
 0x31f   :  { %v1411_v59 = vpop.eup %1410 }
 0x320   :  { %v209_v60 = vmul.f32 %v1411_v59, %v204_v58  ;;  %v207_v61 = vpop.xlane.xlu1 %206  ;;  %v371_v62 = vpop.permute.xlu2 %370  ;;  %vm214_vm7 = vweird.f32 %v1411_v59 }
 0x321   :  { %1412 = vrcp.f32 %v207_v61  ;;  %v321_v63 = vpop.xlane.xlu0 %320  ;;  %394 = vmatpush.msrb.mxu2 %v371_v62  ;;  %vm215_vm9 = vmor %vm213_vm8, %vm214_vm7  ;;  %v234_v20 = vand.u32 2147483648, %v207_v61  ;;  %v232_v23 = vand.u32 2147483647, %v207_v61  ;;  %vm228_vm13 = vweird.f32 %v207_v61 }
 0x322   :  { %v210_v0 = vsub.f32 1.0, %v209_v60  ;;  %1414 = vrcp.f32 %v321_v63  ;;  %v333_v22 = vand.u32 2147483648, %v321_v63  ;;  %v331_v25 = vand.u32 2147483647, %v321_v63 }
 0x323   :  { %vm327_vm14 = vweird.f32 %v321_v63  ;;  %v235_v28 = vor.u32 1.1754944e-38, %v234_v20  ;;  %vm233_vm4 = vcmp.eq.f32.partialorder %v232_v23, 8.507059e+37 }
 0x324   :  { %v211_v2 = vmul.f32 %v1411_v59, %v210_v0  ;;  %v334_v29 = vor.u32 1.1754944e-38, %v333_v22  ;;  %vm332_vm5 = vcmp.eq.f32.partialorder %v331_v25, 8.507059e+37 }
 0x326   :  { %v212_v7 = vadd.f32 %v1411_v59, %v211_v2 }
 0x327   :  { %v1413_v8 = vpop.eup %1412 }
 0x328   :  { %v1415_v12 = vpop.eup %1414  ;;  %v224_v13 = vmul.f32 %v1413_v8, %v207_v61  ;;  %v216_v14 = vsel %vm215_vm9, %v1411_v59, %v212_v7  ;;  %vm229_vm11 = vweird.f32 %v1413_v8 }
 0x329   :  { %v323_v15 = vmul.f32 %v1415_v12, %v321_v63  ;;  %v221_v16 = vsel %vm218_vm10, %v220_v10, %v216_v14  ;;  %vm328_vm12 = vweird.f32 %v1415_v12  ;;  %vm230_vm15 = vmor %vm228_vm13, %vm229_vm11 }
 0x32a   :  { %v225_v17 = vsub.f32 1.0, %v224_v13  ;;  %v222_v18 = vmul.f32 %v1656_v34, %v221_v16  ;;  %vm329_vm3 = vmor %vm327_vm14, %vm328_vm12 }
 0x32b   :  { %v324_v19 = vsub.f32 1.0, %v323_v15 }
 0x32c   :  { %v226_v21 = vmul.f32 %v1413_v8, %v225_v17  ;;  %1052 = vst.msk [vmem:[#allocation6] sm:$0xff] %vm42_vm0, %v222_v18 }
 0x32d   :  { %v325_v24 = vmul.f32 %v1415_v12, %v324_v19 }
 0x32e   :  { %v227_v26 = vadd.f32 %v1413_v8, %v226_v21 }
 0x32f   :  { %v326_v27 = vadd.f32 %v1415_v12, %v325_v24 }
 0x330   :  { %v231_v30 = vsel %vm230_vm15, %v1413_v8, %v227_v26 }
 0x331   :  { %v330_v31 = vsel %vm329_vm3, %v1415_v12, %v326_v27  ;;  %v236_v32 = vsel %vm233_vm4, %v235_v28, %v231_v30 }
 0x332   :  { %v335_v33 = vsel %vm332_vm5, %v334_v29, %v330_v31  ;;  %v237_v34 = vmul.f32 %v1660_v39, %v236_v32  ;;  %v1722_v39 = vld [vmem:[%s1955_s2 + $0x8] sm:$0xff] }
 0x333   :  { %v336_v35 = vmul.f32 %v1662_v40, %v335_v33 }
 0x334   :  { %v569_v36 = vpop.permute.xlu0 %568  ;;  %275 = vmatpush.msrb.mxu3 %v237_v34  ;;  %1053 = vst.msk [vmem:[#allocation6 + $0x8] sm:$0xff] %vm42_vm0, %v237_v34 }
 0x335   :  { %1365 = vmatpush.xpose.msk.msrb.mxu0 %vm75_vm1, %v569_v36  ;;  %619 = vxpose.xlu1.b32.start.end [1/1] (short) (narrow) %v569_v36, 16  ;;  %1049 = vst.msk [vmem:[#allocation4 + $0x8] sm:$0xff] %vm100_vm2, %v336_v35 }
 0x336   :  { %276 = vmatpush.msrb.mxu3 %v222_v18 }
 0x337   :  { %1355 = vmatmul.msk.f32.vlgmr.msrb.gmra.mxu3 %vm75_vm1, %v1619_v5  ;;  %v1729_v5 = vld [vmem:[%s1955_s2] sm:$0xff] }
 0x338   :  { %468 = vmatpush.msra.mxu3 %v371_v62  ;;  %v1749_v53 = vpop.permute.xlu1 %859 }
 0x33a   :  { %535 = vmatpush.msrb.mxu3 %v1709_v37 }
 0x33c   :  { %536 = vmatpush.msrb.mxu3 %v1716_v38 }
 0x33e   :  { %537 = vmatpush.msrb.mxu3 %v1722_v39 }
 0x33f   :  { %1360 = vmatmul.msk.f32.vlgmr.msra.gmra.mxu3 %vm100_vm2, %v336_v35  ;;  %v258_v40 = vpop.f32.mrf.mxu3 }
 0x340   :  { %538 = vmatpush.msrb.mxu3 %v1729_v5 }
 0x347   :  { %1363 = vmatmul.msk.f32.vlgmr.msrb.gmra.mxu3 %vm42_vm0, %v258_v40 }
 0x388   :  { %v354_v43 = vpop.trf.xlu0 }
 0x389   :  { %1358 = vmatmul.msk.f32.vlgmr.msrb.gmra.mxu2 %vm100_vm2, %v354_v43 }
 0x390   :  { %v355_v47 = vpop.trf.xlu0 }
 0x391   :  { %1359 = vmatmul.msk.f32.gmra.mxu2 %vm100_vm2, %v355_v47 }
 0x3ba   :  { %v1734_v41 = vpop.f32.mrf.mxu3 }
 0x3c2   :  { %v470_v42 = vpop.f32.mrf.mxu3 }
 0x3c3   :  { %1362 = vmatmul.msk.f32.vlgmr.msra.gmra.mxu0 %vm42_vm0, %v470_v42 }
 0x3ca   :  { %v1767_v27 = vpop.f32.mrf.mxu3 }
 0x3cb   :  { %1366 = vmatmul.msk.f32.vlgmr.msrb.gmra.mxu0 %vm75_vm1, %v1647_v11 }
 0x3d9   :  { %v635_v61 = vpop.trf.xlu1 }
 0x3e1   :  { %v636_v63 = vpop.trf.xlu1 }
 0x40c   :  { %v396_v48 = vpop.f32.mrf.mxu2 }
 0x40d   :  { %v402_v49 = vsel %vm42_vm0, %v396_v48, -inf }
 0x40e   :  { %403 = vmax.xlane.f32.xlu1 %v402_v49 }
 0x414   :  { %v399_v0 = vpop.f32.mrf.mxu2 }
 0x415   :  { %v405_v1 = vsel %vm42_vm0, %v399_v0, -inf }
 0x440   :  { %v1740_v44 = vpop.f32.mrf.mxu0 }
 0x448   :  { %v591_v45 = vpop.f32.mrf.mxu0 }
 0x449   :  { %v594_v46 = vsel %vm100_vm2, %v591_v45, -inf }
 0x44a   :  { %595 = vmax.xlane.f32.xlu2 %v594_v46 }
 0x462   :  { %776 = vrot.lane.b32.xlu2 %v1647_v11, %s1535_s24 }
 0x46a   :  { %651 = vrot.lane.b32.xlu2 %v1647_v11, %s1537_s25 }
 0x481   :  { %v404_v17 = vpop.xlane.xlu1 %403 }
 0x482   :  { %v408_v20 = vsub.f32 %v396_v48, %v404_v17 }
 0x484   :  { %v410_v22 = vmul.f32 1.442695, %v408_v20 }
 0x4bd   :  { %v596_v50 = vpop.xlane.xlu2 %595 }
 0x4be   :  { %v597_v51 = vsub.f32 %v591_v45, %v596_v50 }
 0x4c0   :  { %v598_v52 = vmul.f32 1.442695, %v597_v51 }
 0x4c2   :  { %1416 = vpow2.f32 %v598_v52 }
 0x4c5   :  { %v777_v58 = vpop.permute.xlu2 %776 }
 0x4c6   :  { %1371 = vmatpush.xpose.msk.msra.mxu0 %vm75_vm1, %v777_v58  ;;  %827 = vxpose.xlu2.b32.start.end [1/1] (short) (narrow) %v777_v58, 16 }
 0x4c8   :  { %v1417_v59 = vpop.eup %1416 }
 0x4c9   :  { %v600_v60 = vsel %vm100_vm2, %v1417_v59, 0.0 }
 0x4ca   :  { %601 = vadd.xlane.f32.xlu0 %v600_v60 }
 0x4cd   :  { %v652_v62 = vpop.permute.xlu2 %651 }
 0x4ce   :  { %675 = vmatpush.msra.mxu2 %v652_v62  ;;  %749 = vmatpush.msra.mxu3 %v652_v62 }
 0x4cf   :  { %1367 = vmatmul.msk.f32.vlgmr.msra.gmra.mxu2 %vm100_vm2, %v635_v61 }
 0x4d0   :  { %883 = vmatpush.msrb.mxu3 %v1749_v53  ;;  %997 = vmatpush.msrb.mxu2 %v1678_v54 }
 0x4d2   :  { %998 = vmatpush.msrb.mxu2 %v1684_v55 }
 0x4d4   :  { %999 = vmatpush.msrb.mxu2 %v1690_v56 }
 0x4d6   :  { %1000 = vmatpush.msrb.mxu2 %v1695_v57 }
 0x4d7   :  { %1368 = vmatmul.msk.f32.gmra.mxu2 %vm100_vm2, %v636_v63 }
 0x53d   :  { %v602_v2 = vpop.xlane.xlu0 %601 }
 0x53e   :  { %1418 = vrcp.f32 %v602_v2  ;;  %v614_v10 = vand.u32 2147483648, %v602_v2  ;;  %v612_v55 = vand.u32 2147483647, %v602_v2  ;;  %vm608_vm7 = vweird.f32 %v602_v2 }
 0x53f   :  { %406 = vmax.xlane.f32.xlu2 %v405_v1 }
 0x540   :  { %v615_v56 = vor.u32 1.1754944e-38, %v614_v10  ;;  %vm613_vm9 = vcmp.eq.f32.partialorder %v612_v55, 8.507059e+37 }
 0x544   :  { %v1419_v3 = vpop.eup %1418 }
 0x545   :  { %v604_v7 = vmul.f32 %v1419_v3, %v602_v2  ;;  %vm609_vm6 = vweird.f32 %v1419_v3 }
 0x546   :  { %vm610_vm8 = vmor %vm608_vm7, %vm609_vm6 }
 0x547   :  { %v605_v8 = vsub.f32 1.0, %v604_v7 }
 0x549   :  { %v606_v54 = vmul.f32 %v1419_v3, %v605_v8 }
 0x54b   :  { %v607_v12 = vadd.f32 %v1419_v3, %v606_v54 }
 0x54d   :  { %v611_v57 = vsel %vm610_vm8, %v1419_v3, %v607_v12 }
 0x54e   :  { %v616_v13 = vsel %vm613_vm9, %v615_v56, %v611_v57 }
 0x54f   :  { %v617_v14 = vmul.f32 %v1417_v59, %v616_v13 }
 0x551   :  { %1369 = vmatmul.msk.f32.vlgmr.msra.gmra.mxu3 %vm100_vm2, %v617_v14  ;;  %1050 = vst.msk [vmem:[#allocation4 + $0x10] sm:$0xff] %vm100_vm2, %v617_v14 }
 0x552   :  { %v1777_v31 = vpop.f32.mrf.mxu2 }
 0x553   :  { %v683_v36 = vsel %vm42_vm0, %v1777_v31, -inf }
 0x55a   :  { %v680_v32 = vpop.f32.mrf.mxu2 }
 0x55b   :  { %v686_v33 = vsel %vm42_vm0, %v680_v32, -inf }
 0x55f   :  { %v843_v15 = vpop.trf.xlu2 }
 0x560   :  { %1373 = vmatmul.msk.f32.vlgmr.msrb.gmra.mxu3 %vm100_vm2, %v843_v15 }
 0x567   :  { %v844_v16 = vpop.trf.xlu2 }
 0x568   :  { %1374 = vmatmul.msk.f32.gmra.mxu3 %vm100_vm2, %v844_v16 }
 0x5b2   :  { %v407_v18 = vpop.xlane.xlu2 %406 }
 0x5b3   :  { %v409_v19 = vsub.f32 %v399_v0, %v407_v18 }
 0x5b5   :  { %v412_v21 = vmul.f32 1.442695, %v409_v19 }
 0x5b7   :  { %1420 = vpow2.f32 %v412_v21 }
 0x5b8   :  { %1422 = vpow2.f32 %v410_v22 }
 0x5bd   :  { %v1421_v23 = vpop.eup %1420 }
 0x5be   :  { %v417_v24 = vsel %vm42_vm0, %v1421_v23, 0.0  ;;  %v1423_v25 = vpop.eup %1422 }
 0x5bf   :  { %418 = vadd.xlane.f32.xlu0 %v417_v24  ;;  %v414_v26 = vsel %vm42_vm0, %v1423_v25, 0.0 }
 0x5c7   :  { %415 = vadd.xlane.f32.xlu0 %v414_v26 }
 0x5d4   :  { %v1769_v28 = vpop.f32.mrf.mxu3 }
 0x5db   :  { %774 = vrot.lane.b32.xlu0 %v1647_v11, %s1534_s23  ;;  %s1301_s23 = sshll.u32 %s1961_s8, 4  ;;  %s1302_s23 = int_to_ptr.hbm [resolvable:$true] %s1301_s23 }
 0x5e3   :  { %v1773_v29 = vpop.f32.mrf.mxu3 }
 0x5e4   :  { %v891_v30 = vsel %vm42_vm0, %v1773_v29, -inf }
 0x5e5   :  { %892 = vmax.xlane.f32.xlu2 %v891_v30 }
 0x5eb   :  { %v888_v34 = vpop.f32.mrf.mxu3 }
 0x5ec   :  { %v894_v35 = vsel %vm42_vm0, %v888_v34, -inf }
 0x605   :  { %687 = vmax.xlane.f32.xlu0 %v686_v33  ;;  %v1814_v33 = vld [vmem:[%s1956_s3] sm:$0xff] }
 0x60d   :  { %895 = vmax.xlane.f32.xlu0 %v894_v35 }
 0x615   :  { %684 = vmax.xlane.f32.xlu0 %v683_v36 }
 0x632   :  { %v419_v40 = vpop.xlane.xlu0 %418 }
 0x633   :  { %1424 = vrcp.f32 %v419_v40  ;;  %v446_v47 = vand.u32 2147483648, %v419_v40  ;;  %v444_v49 = vand.u32 2147483647, %v419_v40  ;;  %vm440_vm11 = vweird.f32 %v419_v40 }
 0x635   :  { %v447_v52 = vor.u32 1.1754944e-38, %v446_v47  ;;  %vm445_vm13 = vcmp.eq.f32.partialorder %v444_v49, 8.507059e+37 }
 0x639   :  { %v1425_v42 = vpop.eup %1424 }
 0x63a   :  { %v436_v43 = vmul.f32 %v1425_v42, %v419_v40  ;;  %v416_v45 = vpop.xlane.xlu0 %415  ;;  %vm441_vm10 = vweird.f32 %v1425_v42 }
 0x63b   :  { %1426 = vrcp.f32 %v416_v45  ;;  %vm442_vm12 = vmor %vm440_vm11, %vm441_vm10  ;;  %v431_v63 = vand.u32 2147483648, %v416_v45  ;;  %v429_v1 = vand.u32 2147483647, %v416_v45  ;;  %vm425_vm15 = vweird.f32 %v416_v45 }
 0x63c   :  { %v437_v46 = vsub.f32 1.0, %v436_v43 }
 0x63d   :  { %v432_v3 = vor.u32 1.1754944e-38, %v431_v63  ;;  %vm430_vm4 = vcmp.eq.f32.partialorder %v429_v1, 8.507059e+37 }
 0x63e   :  { %v438_v48 = vmul.f32 %v1425_v42, %v437_v46 }
 0x640   :  { %v439_v50 = vadd.f32 %v1425_v42, %v438_v48 }
 0x641   :  { %v1427_v51 = vpop.eup %1426 }
 0x642   :  { %v421_v58 = vmul.f32 %v1427_v51, %v416_v45  ;;  %v443_v59 = vsel %vm442_vm12, %v1425_v42, %v439_v50  ;;  %vm426_vm14 = vweird.f32 %v1427_v51 }
 0x643   :  { %v448_v60 = vsel %vm445_vm13, %v447_v52, %v443_v59  ;;  %vm427_vm3 = vmor %vm425_vm15, %vm426_vm14 }
 0x644   :  { %v422_v61 = vsub.f32 1.0, %v421_v58  ;;  %v449_v62 = vmul.f32 %v1421_v23, %v448_v60 }
 0x646   :  { %v423_v0 = vmul.f32 %v1427_v51, %v422_v61  ;;  %487 = vmatpush.msrb.mxu1 %v449_v62  ;;  %1055 = vst.msk [vmem:[#allocation6 + $0x18] sm:$0xff] %vm42_vm0, %v449_v62 }
 0x648   :  { %v424_v2 = vadd.f32 %v1427_v51, %v423_v0 }
 0x64a   :  { %v428_v7 = vsel %vm427_vm3, %v1427_v51, %v424_v2 }
 0x64b   :  { %v433_v8 = vsel %vm430_vm4, %v432_v3, %v428_v7 }
 0x64c   :  { %v434_v10 = vmul.f32 %v1423_v25, %v433_v8 }
 0x64d   :  { %v1784_v54 = vpop.permute.xlu0 %774 }
 0x64e   :  { %488 = vmatpush.msrb.mxu1 %v434_v10  ;;  %1054 = vst.msk [vmem:[#allocation6 + $0x10] sm:$0xff] %vm42_vm0, %v434_v10  ;;  %1372 = vmatmul.msk.f32.vlgmr.msra.gmra.mxu0 %vm75_vm1, %v1784_v54 }
 0x64f   :  { %1361 = vmatmul.msk.f32.vlgmr.msrb.gmra.mxu1 %vm75_vm1, %v1641_v9 }
 0x658   :  { %v893_v57 = vpop.xlane.xlu2 %892 }
 0x659   :  { %v897_v16 = vsub.f32 %v1773_v29, %v893_v57 }
 0x65b   :  { %v899_v19 = vmul.f32 1.442695, %v897_v16 }
 0x678   :  { %v688_v55 = vpop.xlane.xlu0 %687 }
 0x679   :  { %v690_v12 = vsub.f32 %v680_v32, %v688_v55 }
 0x67b   :  { %v693_v56 = vmul.f32 1.442695, %v690_v12 }
 0x67d   :  { %1428 = vpow2.f32 %v693_v56 }
 0x680   :  { %v896_v13 = vpop.xlane.xlu0 %895 }
 0x681   :  { %v898_v14 = vsub.f32 %v888_v34, %v896_v13 }
 0x683   :  { %v1429_v15 = vpop.eup %1428  ;;  %v901_v17 = vmul.f32 1.442695, %v898_v14 }
 0x684   :  { %v698_v18 = vsel %vm42_vm0, %v1429_v15, 0.0 }
 0x685   :  { %1430 = vpow2.f32 %v901_v17  ;;  %699 = vadd.xlane.f32.xlu0 %v698_v18 }
 0x686   :  { %1432 = vpow2.f32 %v899_v19 }
 0x688   :  { %v685_v20 = vpop.xlane.xlu0 %684 }
 0x689   :  { %v689_v21 = vsub.f32 %v1777_v31, %v685_v20 }
 0x68b   :  { %v1794_v9 = vpop.eup %1430  ;;  %v691_v22 = vmul.f32 1.442695, %v689_v21 }
 0x68c   :  { %v906_v23 = vsel %vm42_vm0, %v1794_v9, 0.0  ;;  %v1798_v24 = vpop.eup %1432 }
 0x68d   :  { %1434 = vpow2.f32 %v691_v22  ;;  %907 = vadd.xlane.f32.xlu2 %v906_v23  ;;  %v903_v29 = vsel %vm42_vm0, %v1798_v24, 0.0 }
 0x693   :  { %v1800_v25 = vpop.eup %1434 }
 0x694   :  { %v695_v26 = vsel %vm42_vm0, %v1800_v25, 0.0 }
 0x695   :  { %696 = vadd.xlane.f32.xlu1 %v695_v26  ;;  %904 = vadd.xlane.f32.xlu2 %v903_v29 }
 0x6cb   :  { %v1806_v30 = vpop.f32.mrf.mxu0 }
 0x6cc   :  { %v490_v31 = vpop.f32.mrf.mxu1  ;;  %v802_v32 = vsel %vm100_vm2, %v1806_v30, -inf }
 0x6cd   :  { %561 = vmatpush.msra.mxu1 %v490_v31  ;;  %803 = vmax.xlane.f32.xlu0 %v802_v32 }
 0x6cf   :  { %562 = vmatpush.msra.mxu1 %v1734_v41 }
 0x6d0   :  { %1364 = vmatmul.msk.f32.vlgmr.msra.gmra.mxu1 %vm75_vm1, %v1814_v33 }
 0x6f8   :  { %v700_v34 = vpop.xlane.xlu0 %699 }
 0x6f9   :  { %1436 = vrcp.f32 %v700_v34  ;;  %v727_v45 = vand.u32 2147483648, %v700_v34  ;;  %v725_v46 = vand.u32 2147483647, %v700_v34  ;;  %vm721_vm6 = vweird.f32 %v700_v34 }
 0x6fb   :  { %v728_v48 = vor.u32 1.1754944e-38, %v727_v45  ;;  %vm726_vm8 = vcmp.eq.f32.partialorder %v725_v46, 8.507059e+37 }
 0x6ff   :  { %v1437_v35 = vpop.eup %1436 }
 0x700   :  { %v717_v36 = vmul.f32 %v1437_v35, %v700_v34  ;;  %v908_v40 = vpop.xlane.xlu2 %907  ;;  %vm722_vm5 = vweird.f32 %v1437_v35 }
 0x701   :  { %1438 = vrcp.f32 %v908_v40  ;;  %vm723_vm7 = vmor %vm721_vm6, %vm722_vm5  ;;  %v935_v60 = vand.u32 2147483648, %v908_v40  ;;  %v933_v63 = vand.u32 2147483647, %v908_v40  ;;  %vm929_vm10 = vweird.f32 %v908_v40 }
 0x702   :  { %v718_v42 = vsub.f32 1.0, %v717_v36 }
 0x703   :  { %v936_v2 = vor.u32 1.1754944e-38, %v935_v60  ;;  %vm934_vm12 = vcmp.eq.f32.partialorder %v933_v63, 8.507059e+37 }
 0x704   :  { %v719_v43 = vmul.f32 %v1437_v35, %v718_v42 }
 0x706   :  { %v720_v41 = vadd.f32 %v1437_v35, %v719_v43 }
 0x707   :  { %v1439_v47 = vpop.eup %1438 }
 0x708   :  { %v925_v49 = vmul.f32 %v1439_v47, %v908_v40  ;;  %v697_v50 = vpop.xlane.xlu1 %696  ;;  %v905_v51 = vpop.xlane.xlu2 %904  ;;  %v724_v52 = vsel %vm723_vm7, %v1437_v35, %v720_v41  ;;  %vm930_vm9 = vweird.f32 %v1439_v47 }
 0x709   :  { %1440 = vrcp.f32 %v697_v50  ;;  %v729_v59 = vsel %vm726_vm8, %v728_v48, %v724_v52  ;;  %vm931_vm11 = vmor %vm929_vm10, %vm930_vm9  ;;  %v712_v57 = vand.u32 2147483648, %v697_v50  ;;  %v710_v16 = vand.u32 2147483647, %v697_v50  ;;  %v1062_v48 = vld [vmem:[%s1957_s4 + $0x10] sm:$0xff] }
 0x70a   :  { %v926_v58 = vsub.f32 1.0, %v925_v49  ;;  %1442 = vrcp.f32 %v905_v51  ;;  %v730_v61 = vmul.f32 %v1429_v15, %v729_v59  ;;  %v920_v15 = vand.u32 2147483648, %v905_v51  ;;  %v1061_v49 = vld [vmem:[%s1957_s4 + $0x8] sm:$0xff] }
 0x70b   :  { %v918_v18 = vand.u32 2147483647, %v905_v51  ;;  %vm706_vm15 = vweird.f32 %v697_v50  ;;  %v713_v20 = vor.u32 1.1754944e-38, %v712_v57  ;;  %vm914_vm3 = vweird.f32 %v905_v51 }
 0x70c   :  { %v927_v62 = vmul.f32 %v1439_v47, %v926_v58  ;;  %768 = vmatpush.msrb.mxu1 %v730_v61  ;;  %1057 = vst.msk [vmem:[#allocation6 + $0x28] sm:$0xff] %vm42_vm0, %v730_v61  ;;  %v921_v22 = vor.u32 1.1754944e-38, %v920_v15  ;;  %vm711_vm5 = vcmp.eq.f32.partialorder %v710_v16, 8.507059e+37  ;;  %v541_v58 = vadd.f32 %v1767_v27, %v1740_v44 }
 0x70d   :  { %vm919_vm7 = vcmp.eq.f32.partialorder %v918_v18, 8.507059e+37 }
 0x70e   :  { %v928_v0 = vadd.f32 %v1439_v47, %v927_v62 }
 0x70f   :  { %v1441_v1 = vpop.eup %1440 }
 0x710   :  { %v1443_v3 = vpop.eup %1442  ;;  %v702_v7 = vmul.f32 %v1441_v1, %v697_v50  ;;  %v932_v8 = vsel %vm931_vm11, %v1439_v47, %v928_v0  ;;  %vm707_vm13 = vweird.f32 %v1441_v1  ;;  %v1060_v50 = vld [vmem:[%s1957_s4] sm:$0xff] }
 0x711   :  { %v910_v10 = vmul.f32 %v1443_v3, %v905_v51  ;;  %v937_v55 = vsel %vm934_vm12, %v936_v2, %v932_v8  ;;  %vm915_vm14 = vweird.f32 %v1443_v3  ;;  %vm708_vm4 = vmor %vm706_vm15, %vm707_vm13  ;;  %v1539_v8 = vmov 32.0  }
 0x712   :  { %v703_v12 = vsub.f32 1.0, %v702_v7  ;;  %v938_v56 = vmul.f32 %v1794_v9, %v937_v55  ;;  %vm916_vm6 = vmor %vm914_vm3, %vm915_vm14 }
 0x713   :  { %v911_v13 = vsub.f32 1.0, %v910_v10 }
 0x714   :  { %v704_v14 = vmul.f32 %v1441_v1, %v703_v12  ;;  %976 = vmatpush.msrb.mxu0 %v938_v56  ;;  %1059 = vst.msk [vmem:[#allocation6 + $0x38] sm:$0xff] %vm42_vm0, %v938_v56 }
 0x715   :  { %v912_v17 = vmul.f32 %v1443_v3, %v911_v13 }
 0x716   :  { %v705_v19 = vadd.f32 %v1441_v1, %v704_v14 }
 0x717   :  { %v913_v21 = vadd.f32 %v1443_v3, %v912_v17 }
 0x718   :  { %v709_v9 = vsel %vm708_vm4, %v1441_v1, %v705_v19  ;;  %vm1207_vm4 = vcmask 523264  }
 0x719   :  { %v714_v23 = vsel %vm711_vm5, %v713_v20, %v709_v9  ;;  %v917_v26 = vsel %vm916_vm6, %v1443_v3, %v913_v21  ;;  %v1161_v21 = vld [vmem:[%s1958_s5 + $0x18] sm:$0xff]  ;;  %v1159_v9 = vld [vmem:[%s1958_s5 + $0x8] sm:$0xff] }
 0x71a   :  { %v715_v29 = vmul.f32 %v1800_v25, %v714_v23  ;;  %v922_v31 = vsel %vm919_vm7, %v921_v22, %v917_v26  ;;  %1183 = vmatpush.msra.mxu3 %v1161_v21  ;;  %v1160_v22 = vld [vmem:[%s1958_s5 + $0x10] sm:$0xff]  ;;  %v1158_v23 = vld [vmem:[%s1958_s5] sm:$0xff] }
 0x71b   :  { %v923_v32 = vmul.f32 %v1798_v24, %v922_v31 }
 0x71c   :  { %769 = vmatpush.msrb.mxu1 %v715_v29  ;;  %1056 = vst.msk [vmem:[#allocation6 + $0x20] sm:$0xff] %vm42_vm0, %v715_v29  ;;  %1184 = vmatpush.msra.mxu3 %v1160_v22 }
 0x71d   :  { %977 = vmatpush.msrb.mxu0 %v923_v32  ;;  %1058 = vst.msk [vmem:[#allocation6 + $0x30] sm:$0xff] %vm42_vm0, %v923_v32  ;;  %1370 = vmatmul.msk.f32.vlgmr.msrb.gmra.mxu1 %vm75_vm1, %v1647_v11  ;;  %v1203_v32 = vld [vmem:[%s1959_s6 + $0x38] sm:$0xff] }
 0x71e   :  { %957 = vmatpush.msra.mxu1 %v1749_v53  ;;  %1376 = vmatmul.msk.f32.vlgmr.msrb.gmra.mxu0 %vm75_vm1, %v1784_v54 }
 0x71f   :  { %1185 = vmatpush.msra.mxu3 %v1159_v9 }
 0x720   :  { %1020 = vmatpush.msrb.mxu1 %v1709_v37 }
 0x721   :  { %1186 = vmatpush.msra.mxu3 %v1158_v23 }
 0x722   :  { %1021 = vmatpush.msrb.mxu1 %v1716_v38 }
 0x724   :  { %1022 = vmatpush.msrb.mxu1 %v1722_v39 }
 0x726   :  { %1023 = vmatpush.msrb.mxu1 %v1729_v5 }
 0x740   :  { %v804_v24 = vpop.xlane.xlu0 %803 }
 0x741   :  { %v805_v25 = vsub.f32 %v1806_v30, %v804_v24  ;;  %v1202_v24 = vld [vmem:[%s1959_s6 + $0x30] sm:$0xff] }
 0x743   :  { %v806_v34 = vmul.f32 1.442695, %v805_v25  ;;  %v1201_v25 = vld [vmem:[%s1959_s6 + $0x28] sm:$0xff] }
 0x745   :  { %1444 = vpow2.f32 %v806_v34 }
 0x74b   :  { %v1445_v35 = vpop.eup %1444 }
 0x74c   :  { %v808_v11 = vsel %vm100_vm2, %v1445_v35, 0.0 }
 0x74d   :  { %809 = vadd.xlane.f32.xlu2 %v808_v11  ;;  %v564_v53 = vpop.f32.mrf.mxu1  ;;  %v1200_v11 = vld [vmem:[%s1959_s6 + $0x20] sm:$0xff] }
 0x79a   :  { %v771_v54 = vpop.f32.mrf.mxu1 }
 0x79b   :  { %v979_v36 = vpop.f32.mrf.mxu0 }
 0x79c   :  { %1042 = vmatpush.msra.mxu0 %v979_v36 }
 0x79e   :  { %1043 = vmatpush.msra.mxu0 %v771_v54  ;;  %v1199_v54 = vld [vmem:[%s1959_s6 + $0x18] sm:$0xff] }
 0x79f   :  { %1379 = vmatmul.msk.f32.vlgmr.msra.gmra.mxu0 %vm75_vm1, %v1814_v33  ;;  %v1063_v33 = vld [vmem:[%s1957_s4 + $0x18] sm:$0xff] }
 0x7a0   :  { %1082 = vmatpush.msra.mxu2 %v1063_v33 }
 0x7a2   :  { %1083 = vmatpush.msra.mxu2 %v1062_v48 }
 0x7a4   :  { %1084 = vmatpush.msra.mxu2 %v1061_v49 }
 0x7a6   :  { %1085 = vmatpush.msra.mxu2 %v1060_v50 }
 0x7c0   :  { %v810_v37 = vpop.xlane.xlu2 %809 }
 0x7c1   :  { %1446 = vrcp.f32 %v810_v37  ;;  %v822_v30 = vand.u32 2147483648, %v810_v37  ;;  %v820_v42 = vand.u32 2147483647, %v810_v37  ;;  %vm816_vm9 = vweird.f32 %v810_v37 }
 0x7c2   :  { %1448 = vrcp.f32 %v1539_v8 }
 0x7c3   :  { %v823_v45 = vor.u32 1.1754944e-38, %v822_v30  ;;  %vm821_vm11 = vcmp.eq.f32.partialorder %v820_v42, 8.507059e+37 }
 0x7c7   :  { %v1447_v38 = vpop.eup %1446 }
 0x7c8   :  { %v812_v39 = vmul.f32 %v1447_v38, %v810_v37  ;;  %vm817_vm8 = vweird.f32 %v1447_v38  ;;  %v1449_v10 = vpop.eup %1448 }
 0x7c9   :  { %vm818_vm10 = vmor %vm816_vm9, %vm817_vm8  ;;  %v1104_v44 = vmul.f32 32.0, %v1449_v10  ;;  %vm1108_vm1 = vweird.f32 %v1449_v10 }
 0x7ca   :  { %v813_v5 = vsub.f32 1.0, %v812_v39 }
 0x7cb   :  { %v1105_v27 = vsub.f32 1.0, %v1104_v44 }
 0x7cc   :  { %v814_v40 = vmul.f32 %v1447_v38, %v813_v5 }
 0x7cd   :  { %v1106_v55 = vmul.f32 %v1449_v10, %v1105_v27 }
 0x7ce   :  { %v815_v43 = vadd.f32 %v1447_v38, %v814_v40 }
 0x7cf   :  { %v1107_v12 = vadd.f32 %v1449_v10, %v1106_v55 }
 0x7d0   :  { %v819_v46 = vsel %vm818_vm10, %v1447_v38, %v815_v43  ;;  %v1198_v38 = vld [vmem:[%s1959_s6 + $0x10] sm:$0xff] }
 0x7d1   :  { %v824_v41 = vsel %vm821_vm11, %v823_v45, %v819_v46 }
 0x7d2   :  { %v825_v47 = vmul.f32 %v1445_v35, %v824_v41 }
 0x7d4   :  { %1375 = vmatmul.msk.f32.vlgmr.msra.gmra.mxu1 %vm100_vm2, %v825_v47  ;;  %1051 = vst.msk [vmem:[#allocation4 + $0x18] sm:$0xff] %vm100_vm2, %v825_v47 }
 0x7d5   :  { %1222 = vmatpush.msra.mxu1 %v1203_v32 }
 0x7d7   :  { %1223 = vmatpush.msra.mxu1 %v1202_v24 }
 0x7d9   :  { %1224 = vmatpush.msra.mxu1 %v1201_v25 }
 0x7db   :  { %1225 = vmatpush.msra.mxu1 %v1200_v11 }
 0x7dc   :  { %1378 = vmatmul.msk.f32.vlgmr.msrb.gmra.mxu1 %vm42_vm0, %v1769_v28 }
 0x7dd   :  { %1226 = vmatpush.msra.mxu1 %v1199_v54 }
 0x7df   :  { %1227 = vmatpush.msra.mxu1 %v1198_v38 }
 0x81c   :  { %v1045_v51 = vpop.f32.mrf.mxu0 }
 0x851   :  { %v959_v28 = vpop.f32.mrf.mxu1 }
 0x852   :  { %1377 = vmatmul.msk.f32.vlgmr.msrb.gmra.mxu2 %vm42_vm0, %v959_v28 }
 0x859   :  { %v1025_v63 = vpop.f32.mrf.mxu1 }
 0x85a   :  { %1380 = vmatmul.msk.f32.vlgmr.msra.gmra.mxu2 %vm42_vm0, %v564_v53 }
 0x862   :  { %1381 = vmatmul.msk.f32.gmra.mxu2 %vm42_vm0, %v1045_v51 }
 0x8d5   :  { %v1002_v52 = vpop.f32.mrf.mxu2 }
 0x8d6   :  { %v1026_v0 = vadd.f32 %v1025_v63, %v1002_v52 }
 0x8dd   :  { %v1087_v59 = vpop.f32.mrf.mxu2 }
 0x8de   :  { %v1093_v60 = vadd.f32 %v1087_v59, %v541_v58 }
 0x8e0   :  { %v1095_v61 = vadd.f32 %v1093_v60, %v1615_v4  ;;  %v1866_v4 = vld [vmem:[%s1960_s7] ss:$0 sm:$0xff]  ;;  %v1197_v60 = vld [vmem:[%s1959_s6 + $0x8] sm:$0xff] }
 0x8e1   :  { %1228 = vmatpush.msra.mxu1 %v1197_v60 }
 0x8e2   :  { %v1097_v62 = vsel %vm42_vm0, %v1095_v61, 0.0 }
 0x8e3   :  { %1098 = vadd.xlane.f32.xlu1 %v1097_v62  ;;  %v1399_v62 = vld [vmem:[%s1960_s7 + $0x1] ss:$0 sm:$0xff] }
 0x8e5   :  { %v1090_v1 = vpop.f32.mrf.mxu2 }
 0x8e6   :  { %v1094_v2 = vadd.f32 %v1090_v1, %v1026_v0 }
 0x8e8   :  { %v1096_v3 = vadd.f32 %v1094_v2, %v1632_v6  ;;  %v1870_v6 = vsel %vm1108_vm1, %v1449_v10, %v1107_v12 }
 0x8ea   :  { %v1100_v7 = vsel %vm42_vm0, %v1096_v3, 0.0 }
 0x8eb   :  { %1101 = vadd.xlane.f32.xlu0 %v1100_v7 }
 0x8ff   :  { %1153 = vrot.lane.b32.xlu0 %v1866_v4, %s1536_s1 }
 0x956   :  { %v1099_v56 = vpop.xlane.xlu1 %1098 }
 0x957   :  { %v1110_v57 = vmul.f32 %v1870_v6, %v1099_v56 }
 0x959   :  { %v1112_v13 = vsub.f32 %v1095_v61, %v1110_v57  ;;  %v1196_v61 = vld [vmem:[%s1959_s6] sm:$0xff]  ;;  %s1540_s6 = smov [#allocation4]  }
 0x95a   :  { %1229 = vmatpush.msra.mxu1 %v1196_v61  ;;  %s1312_s7 = sshll.u32 %s1540_s6, 4  ;;  %s1313_s7 = int_to_ptr.vmem [resolvable:$true] %s1312_s7 }
 0x95b   :  { %v1114_v14 = vmul.f32 %v1112_v13, %v1112_v13  ;;  %1320 = dma.vmem_to_hbm [thread:$0]  %s1313_s7, 512, %s1315_s16, [#allocation5], %s1541_s17, %s1541_s17, %s1542_s18  }
 0x95c   :  { %1333 = dma.vmem_to_hbm [thread:$0]  %s1326_s20, 1024, %s1328_s26, [#allocation5], %s1541_s17, %s1541_s17, %s1542_s18  }
 0x95d   :  { %v1116_v15 = vsel %vm42_vm0, %v1114_v14, 0.0 }
 0x95e   :  { %1117 = vadd.xlane.f32.xlu2 %v1116_v15  ;;  %v1102_v16 = vpop.xlane.xlu0 %1101 }
 0x95f   :  { %v1111_v17 = vmul.f32 %v1870_v6, %v1102_v16 }
 0x961   :  { %v1113_v18 = vsub.f32 %v1096_v3, %v1111_v17 }
 0x963   :  { %v1115_v19 = vmul.f32 %v1113_v18, %v1113_v18 }
 0x965   :  { %v1119_v20 = vsel %vm42_vm0, %v1115_v19, 0.0 }
 0x966   :  { %1120 = vadd.xlane.f32.xlu1 %v1119_v20 }
 0x971   :  { %v1154_v33 = vpop.permute.xlu0 %1153 }
 0x976   :  { %1162 = vrot.lane.b32.xlu2 %v1866_v4, %s1537_s25 }
 0x97e   :  { %1283 = vrot.lane.b32.xlu2 %v1399_v62, %s1536_s1 }
 0x9d1   :  { %v1118_v26 = vpop.xlane.xlu2 %1117 }
 0x9d2   :  { %v1122_v29 = vmul.f32 %v1118_v26, %v1870_v6 }
 0x9d4   :  { %v1124_v31 = vadd.f32 1e-06, %v1122_v29 }
 0x9d6   :  { %1450 = vrsqrt.f32 %v1124_v31  ;;  %vm1132_vm12 = vweird.f32 %v1124_v31 }
 0x9d9   :  { %v1121_v34 = vpop.xlane.xlu1 %1120  ;;  %v1163_v63 = vpop.permute.xlu2 %1162 }
 0x9da   :  { %v1123_v35 = vmul.f32 %v1121_v34, %v1870_v6 }
 0x9dc   :  { %v1451_v53 = vpop.eup %1450  ;;  %v1125_v36 = vadd.f32 1e-06, %v1123_v35 }
 0x9dd   :  { %v1127_v37 = vmul.f32 %v1451_v53, %v1124_v31  ;;  %vm1133_vm2 = vweird.f32 %v1451_v53 }
 0x9de   :  { %1452 = vrsqrt.f32 %v1125_v36  ;;  %vm1134_vm13 = vmor %vm1132_vm12, %vm1133_vm2  ;;  %vm1142_vm15 = vweird.f32 %v1125_v36 }
 0x9df   :  { %v1128_v39 = vmul.f32 %v1451_v53, %v1127_v37 }
 0x9e1   :  { %v1129_v5 = vmul.f32 0.5, %v1128_v39 }
 0x9e3   :  { %v1130_v30 = vsub.f32 1.5, %v1129_v5 }
 0x9e4   :  { %v1453_v40 = vpop.eup %1452 }
 0x9e5   :  { %v1131_v42 = vmul.f32 %v1451_v53, %v1130_v30  ;;  %v1137_v43 = vmul.f32 %v1453_v40, %v1125_v36  ;;  %vm1143_vm14 = vweird.f32 %v1453_v40 }
 0x9e6   :  { %vm1144_vm3 = vmor %vm1142_vm15, %vm1143_vm14 }
 0x9e7   :  { %v1138_v45 = vmul.f32 %v1453_v40, %v1137_v43  ;;  %v1135_v46 = vsel %vm1134_vm13, %v1451_v53, %v1131_v42 }
 0x9e8   :  { %v1146_v41 = vmul.f32 %v1135_v46, %v1112_v13 }
 0x9e9   :  { %v1139_v47 = vmul.f32 0.5, %v1138_v45 }
 0x9ea   :  { %v1151_v48 = vmul.f32 %v1866_v4, %v1146_v41 }
 0x9eb   :  { %v1140_v49 = vsub.f32 1.5, %v1139_v47 }
 0x9ec   :  { %v1156_v50 = vadd.f32 %v1154_v33, %v1151_v48 }
 0x9ed   :  { %v1141_v28 = vmul.f32 %v1453_v40, %v1140_v49 }
 0x9ee   :  { %1382 = vmatmul.msk.f32.vlgmr.msra.gmra.mxu3 %vm42_vm0, %v1156_v50 }
 0x9ef   :  { %v1145_v51 = vsel %vm1144_vm3, %v1453_v40, %v1141_v28 }
 0x9f0   :  { %v1147_v52 = vmul.f32 %v1145_v51, %v1113_v18 }
 0x9f2   :  { %v1152_v58 = vmul.f32 %v1866_v4, %v1147_v52 }
 0x9f4   :  { %v1157_v59 = vadd.f32 %v1154_v33, %v1152_v58 }
 0x9f6   :  { %1383 = vmatmul.msk.f32.gmra.mxu3 %vm42_vm0, %v1157_v59 }
 0xa71   :  { %v1188_v0 = vpop.f32.mrf.mxu3 }
 0xa72   :  { %v1189_v1 = vadd.f32 %v1188_v0, %v1163_v63 }
 0xa74   :  { %v1194_v2 = vmax.f32 %v1189_v1, 0.0 }
 0xa76   :  { %1384 = vmatmul.msk.f32.vlgmr.msra.gmra.mxu1 %vm1207_vm4, %v1194_v2 }
 0xa79   :  { %v1191_v3 = vpop.f32.mrf.mxu3 }
 0xa7a   :  { %v1192_v7 = vadd.f32 %v1191_v3, %v1163_v63 }
 0xa7c   :  { %v1195_v8 = vmax.f32 %v1192_v7, 0.0 }
 0xa7e   :  { %1385 = vmatmul.msk.f32.gmra.mxu1 %vm1207_vm4, %v1195_v8 }
 0xaf3   :  { %v1231_v10 = vpop.f32.mrf.mxu1 }
 0xaf4   :  { %v1232_v44 = vadd.f32 %v1399_v62, %v1231_v10 }
 0xaf6   :  { %v1237_v4 = vadd.f32 %v1232_v44, %v1156_v50 }
 0xaf8   :  { %v1239_v27 = vsel %vm42_vm0, %v1237_v4, 0.0 }
 0xaf9   :  { %1240 = vadd.xlane.f32.xlu1 %v1239_v27 }
 0xafb   :  { %v1234_v55 = vpop.f32.mrf.mxu1 }
 0xafc   :  { %v1235_v12 = vadd.f32 %v1399_v62, %v1234_v55 }
 0xafe   :  { %v1238_v56 = vadd.f32 %v1235_v12, %v1157_v59 }
 0xb00   :  { %v1242_v57 = vsel %vm42_vm0, %v1238_v56, 0.0 }
 0xb01   :  { %1243 = vadd.xlane.f32.xlu1 %v1242_v57 }
 0xb6c   :  { %v1241_v13 = vpop.xlane.xlu1 %1240 }
 0xb6d   :  { %v1245_v14 = vmul.f32 %v1241_v13, %v1870_v6 }
 0xb6f   :  { %v1247_v15 = vsub.f32 %v1237_v4, %v1245_v14 }
 0xb71   :  { %v1249_v16 = vmul.f32 %v1247_v15, %v1247_v15 }
 0xb73   :  { %v1251_v17 = vsel %vm42_vm0, %v1249_v16, 0.0 }
 0xb74   :  { %1252 = vadd.xlane.f32.xlu0 %v1251_v17  ;;  %v1244_v18 = vpop.xlane.xlu1 %1243 }
 0xb75   :  { %v1246_v19 = vmul.f32 %v1244_v18, %v1870_v6 }
 0xb77   :  { %v1248_v20 = vsub.f32 %v1238_v56, %v1246_v19 }
 0xb79   :  { %v1250_v21 = vmul.f32 %v1248_v20, %v1248_v20 }
 0xb7b   :  { %v1254_v22 = vsel %vm42_vm0, %v1250_v21, 0.0 }
 0xb7c   :  { %1255 = vadd.xlane.f32.xlu1 %v1254_v22 }
 0xb95   :  { %1288 = vrot.lane.b32.xlu1 %v1399_v62, %s1537_s25 }
 0xbe7   :  { %v1253_v9 = vpop.xlane.xlu0 %1252 }
 0xbe8   :  { %v1257_v23 = vmul.f32 %v1253_v9, %v1870_v6 }
 0xbea   :  { %v1259_v26 = vadd.f32 1e-06, %v1257_v23 }
 0xbec   :  { %1454 = vrsqrt.f32 %v1259_v26  ;;  %vm1267_vm6 = vweird.f32 %v1259_v26 }
 0xbef   :  { %v1256_v29 = vpop.xlane.xlu1 %1255 }
 0xbf0   :  { %v1258_v31 = vmul.f32 %v1256_v29, %v1870_v6  ;;  %v1284_v6 = vpop.permute.xlu2 %1283 }
 0xbf2   :  { %v1455_v32 = vpop.eup %1454  ;;  %v1260_v24 = vadd.f32 1e-06, %v1258_v31 }
 0xbf3   :  { %v1262_v25 = vmul.f32 %v1455_v32, %v1259_v26  ;;  %vm1268_vm5 = vweird.f32 %v1455_v32 }
 0xbf4   :  { %1456 = vrsqrt.f32 %v1260_v24  ;;  %vm1269_vm7 = vmor %vm1267_vm6, %vm1268_vm5  ;;  %vm1277_vm9 = vweird.f32 %v1260_v24 }
 0xbf5   :  { %v1263_v34 = vmul.f32 %v1455_v32, %v1262_v25 }
 0xbf7   :  { %v1264_v35 = vmul.f32 0.5, %v1263_v34 }
 0xbf9   :  { %v1265_v11 = vsub.f32 1.5, %v1264_v35 }
 0xbfa   :  { %v1457_v53 = vpop.eup %1456 }
 0xbfb   :  { %v1272_v36 = vmul.f32 %v1457_v53, %v1260_v24  ;;  %v1266_v54 = vmul.f32 %v1455_v32, %v1265_v11  ;;  %vm1278_vm8 = vweird.f32 %v1457_v53 }
 0xbfc   :  { %vm1279_vm10 = vmor %vm1277_vm9, %vm1278_vm8 }
 0xbfd   :  { %v1273_v37 = vmul.f32 %v1457_v53, %v1272_v36  ;;  %v1270_v39 = vsel %vm1269_vm7, %v1455_v32, %v1266_v54 }
 0xbfe   :  { %v1281_v30 = vmul.f32 %v1270_v39, %v1247_v15 }
 0xbff   :  { %v1274_v38 = vmul.f32 0.5, %v1273_v37 }
 0xc00   :  { %v1286_v45 = vmul.f32 %v1284_v6, %v1281_v30 }
 0xc01   :  { %v1275_v5 = vsub.f32 1.5, %v1274_v38 }
 0xc03   :  { %v1276_v40 = vmul.f32 %v1457_v53, %v1275_v5 }
 0xc05   :  { %v1280_v42 = vsel %vm1279_vm10, %v1457_v53, %v1276_v40 }
 0xc06   :  { %v1282_v43 = vmul.f32 %v1280_v42, %v1248_v20 }
 0xc07   :  { %v1289_v46 = vpop.permute.xlu1 %1288 }
 0xc08   :  { %v1287_v41 = vmul.f32 %v1284_v6, %v1282_v43  ;;  %v1291_v47 = vadd.f32 %v1289_v46, %v1286_v45 }
 0xc0a   :  { %v1292_v33 = vadd.f32 %v1289_v46, %v1287_v41  ;;  %1293 = vst.msk [vmem:[#allocation2] sm:$0xff] %vm42_vm0, %v1291_v47 }
 0xc0c   :  { %1294 = vst.msk [vmem:[#allocation2 + $0x8] sm:$0xff] %vm42_vm0, %v1292_v33 }
 0xc0d   :  { %1307 = dma.vmem_to_hbm [thread:$0]  %s1300_s10, 256, %s1302_s23, [#allocation3], %s1541_s17, %s1541_s17, %s1542_s18  }
 0xc0e   :  { %1530 = dma.done.wait [#allocation3], 256  }
 0xc0f   :  { %1531 = vsyncadd [#allocation3], 4294967040 }
 0xc10   :  { %1532 = dma.done.wait [#allocation5], 1536  }
 0xc11   :  { %1533 = vsyncadd [#allocation5], 4294965760 }
 0xc12   :  { %1346 = vsyncpa [#allocation3], 1 }
 0xc13   :  { %1347 = vsyncpa [#allocation5], 1 }

</bundles_post_ra>
